<compile_context>
chip_gen: v7x
topology: tpu7x:2x2x1
jax: 0.10.0
libtpu: 0.0.40
codegen_flags: <defaults>
</compile_context>

<pallas_src>
import functools

import jax
import jax.numpy as jnp
import numpy as np
from jax import lax
from jax.experimental import pallas as pl
from jax.experimental.pallas import tpu as pltpu

EPS = 1e-6  # Norm eps (added to std; torch.std uses ddof=1)


def encoder_layer_kernel(
    x_ref, mask_ref,
    a1_ref, bn1_ref, a2_ref, bn2_ref,
    wqkv_ref, bqkv_ref, wo_ref, bo_ref,
    w1_ref, bf1_ref, w2_ref, bf2_ref,
    o_ref,
    acc_ref,                       # VMEM scratch (S, D) f32: per-head attention accumulator
    *, heads,
):
    bf16 = jnp.bfloat16
    x = x_ref[0].astype(jnp.float32)            # (S, D)
    S, D = x.shape
    dk = D // heads
    mask = mask_ref[0]                          # (1, S)

    # Hoisted mask bias: one compare/select, reused (added) for every head.
    mask_bias = jnp.where(mask == 0, jnp.float32(-1e9), jnp.float32(0.0))   # (1, S)

    def layer_norm(y, alpha, beta):
        mean = jnp.mean(y, axis=-1, keepdims=True)
        c = y - mean
        var = jnp.sum(c * c, axis=-1, keepdims=True) * (1.0 / (D - 1))  # torch.std ddof=1
        inv = pl.reciprocal(jnp.sqrt(var) + EPS, approx=True)           # EUP
        return alpha * c * inv + beta

    # ---- sublayer 1: x2 = norm_1(x); x = attn(x2, x2, x2, mask); x = x + dropout(x)
    x2 = layer_norm(x, a1_ref[...], bn1_ref[...])
    x2_b = x2.astype(bf16)

    # Fused QKV projection: (S, D) @ (D, 3D), bf16 in / f32 accumulate.
    qkv = jnp.dot(x2_b, wqkv_ref[...], preferred_element_type=jnp.float32) + bqkv_ref[...]
    qkv_b = qkv.astype(bf16)

    inv_sqrt_dk = 1.0 / jnp.sqrt(jnp.float32(dk))
    for h in range(heads):                       # static loop over heads
        qh = qkv_b[:, h * dk:(h + 1) * dk]               # (S, dk)
        kh = qkv_b[:, D + h * dk:D + (h + 1) * dk]       # (S, dk)
        vh = qkv_b[:, 2 * D + h * dk:2 * D + (h + 1) * dk]
        # scores = qh @ kh^T via dot_general (no kh.T materialization)
        s = lax.dot_general(qh, kh, (((1,), (1,)), ((), ())),
                            preferred_element_type=jnp.float32) * inv_sqrt_dk  # (S, S)
        s = s + mask_bias
        s = s - jnp.max(s, axis=-1, keepdims=True)
        p = jnp.exp(s)
        p = p * pl.reciprocal(jnp.sum(p, axis=-1, keepdims=True), approx=True)
        acc_ref[:, h * dk:(h + 1) * dk] = jnp.dot(
            p.astype(bf16), vh, preferred_element_type=jnp.float32)

    attn_out = jnp.dot(acc_ref[...].astype(bf16), wo_ref[...],
                       preferred_element_type=jnp.float32) + bo_ref[...]
    x = attn_out + attn_out                      # x = attn + dropout_1(attn), dropout=identity

    # ---- sublayer 2: x2 = norm_2(x); x = x + dropout(ff(x2))
    x2 = layer_norm(x, a2_ref[...], bn2_ref[...])

    def tap_stack(y_b):
        # Stack the three zero-padded taps y[s-1], y[s], y[s+1] along lanes -> (S, 3C)
        z = jnp.zeros((1, y_b.shape[1]), y_b.dtype)
        ym1 = jnp.concatenate([z, y_b[:-1]], axis=0)     # y[s-1]
        yp1 = jnp.concatenate([y_b[1:], z], axis=0)      # y[s+1]
        return jnp.concatenate([ym1, y_b, yp1], axis=-1)

    # TODO(synk): ConvFeedForward source not available; assumed
    #   Conv1d(d_model, d_ff, 3, padding=1) -> ReLU -> Dropout -> Conv1d(d_ff, d_model, 3, padding=1)
    h1 = jnp.dot(tap_stack(x2.astype(bf16)), w1_ref[...],
                 preferred_element_type=jnp.float32) + bf1_ref[...]      # (S, F)
    h1 = jnp.maximum(h1, 0.0)
    f = jnp.dot(tap_stack(h1.astype(bf16)), w2_ref[...],
                preferred_element_type=jnp.float32) + bf2_ref[...]       # (S, D)

    o_ref[0] = (x + f).astype(o_ref.dtype)


def encoder_layer_conv(x, src_mask, params, *, heads):
    B, S, D = x.shape
    F = params["w1"].shape[2]
    bf16 = jnp.bfloat16

    # Host-side weight preprocessing: pre-transpose to (in, out), fuse QKV, flatten
    # conv taps, and cast matmul weights to bf16 (biases / norm params stay f32).
    wqkv = jnp.concatenate([params["wq"].T, params["wk"].T, params["wv"].T],
                           axis=1).astype(bf16)                      # (D, 3D)
    bqkv = jnp.concatenate([params["bq"], params["bk"], params["bv"]], axis=1)  # (1, 3D)
    wo = params["wo"].T.astype(bf16)                                 # (D, D)
    w1 = params["w1"].reshape(3 * D, F).astype(bf16)                 # (3D, F), tap order [-1,0,+1]
    w2 = params["w2"].reshape(3 * F, D).astype(bf16)                 # (3F, D)

    def full(shape):
        return pl.BlockSpec(shape, lambda b, _n=len(shape): (0,) * _n)

    in_specs = [
        pl.BlockSpec((1, S, D), lambda b: (b, 0, 0)),    # x
        pl.BlockSpec((1, 1, S), lambda b: (b, 0, 0)),    # src_mask
        full((1, D)), full((1, D)), full((1, D)), full((1, D)),   # norm1/norm2 alpha, bias
        full((D, 3 * D)), full((1, 3 * D)),              # fused Wqkv, bqkv
        full((D, D)), full((1, D)),                      # Wo, bo
        full((3 * D, F)), full((1, F)),                  # conv1 weight (flattened taps), bias
        full((3 * F, D)), full((1, D)),                  # conv2 weight, bias
    ]

    kernel = functools.partial(encoder_layer_kernel, heads=heads)
    return pl.pallas_call(
        kernel,
        out_shape=jax.ShapeDtypeStruct((B, S, D), jnp.float32),
        grid=(B,),
        in_specs=in_specs,
        out_specs=pl.BlockSpec((1, S, D), lambda b: (b, 0, 0)),
        scratch_shapes=[pltpu.VMEM((S, D), jnp.float32)],
        compiler_params=pltpu.CompilerParams(
            dimension_semantics=("parallel",),           # batch is independent (megacore)
            vmem_limit_bytes=64 * 1024 * 1024,
        ),
    )(
        x, src_mask,
        params["a1"], params["bn1"], params["a2"], params["bn2"],
        wqkv, bqkv, wo, params["bo"],
        w1, params["bf1"], w2, params["bf2"],
    )


def reference(x, mask, p, *, heads):
    """Pure-JAX replica of the PyTorch forward (eval mode), using the same numerics
    policy as the kernel: bf16 matmul inputs, f32 accumulation / element-wise math."""
    B, S, D = x.shape
    dk = D // heads
    bf16 = jnp.bfloat16

    def norm(y, a, b):
        mean = y.mean(-1, keepdims=True)
        var = ((y - mean) ** 2).sum(-1, keepdims=True) / (D - 1)
        return a * (y - mean) / (jnp.sqrt(var) + EPS) + b

    def mm(a, b):
        return jnp.dot(a.astype(bf16), b.astype(bf16), preferred_element_type=jnp.float32)

    x2 = norm(x, p["a1"][0], p["bn1"][0])
    q = mm(x2, p["wq"].T) + p["bq"][0]
    k = mm(x2, p["wk"].T) + p["bk"][0]
    v = mm(x2, p["wv"].T) + p["bv"][0]
    q = q.reshape(B, S, heads, dk).transpose(0, 2, 1, 3)
    k = k.reshape(B, S, heads, dk).transpose(0, 2, 1, 3)
    v = v.reshape(B, S, heads, dk).transpose(0, 2, 1, 3)
    s = jnp.einsum("bhqd,bhkd->bhqk", q.astype(bf16), k.astype(bf16),
                   preferred_element_type=jnp.float32) / jnp.sqrt(jnp.float32(dk))
    s = jnp.where(mask[:, None, :, :] == 0, -1e9, s)
    a = jax.nn.softmax(s, axis=-1)
    o = jnp.einsum("bhqk,bhkd->bhqd", a.astype(bf16), v.astype(bf16),
                   preferred_element_type=jnp.float32)
    o = o.transpose(0, 2, 1, 3).reshape(B, S, D)
    attn_out = mm(o, p["wo"].T) + p["bo"][0]
    x = attn_out + attn_out
    x2 = norm(x, p["a2"][0], p["bn2"][0])

    def shift(y, t):
        if t == 0:
            return y
        z = jnp.zeros_like(y[:, :1])
        return (jnp.concatenate([y[:, 1:], z], 1) if t == 1
                else jnp.concatenate([z, y[:, :-1]], 1))

    h = p["bf1"][0]
    for t in range(3):
        h = h + mm(shift(x2, t - 1), p["w1"][t])
    h = jnp.maximum(h, 0.0)
    f = p["bf2"][0]
    for t in range(3):
        f = f + mm(shift(h, t - 1), p["w2"][t])
    return x + f


def make_params(key, d_model, d_ff):
    ks = jax.random.split(key, 12)
    n = lambda k, shape, s=0.1: (jax.random.normal(k, shape, jnp.float32) * s)
    return {
        "a1": jnp.ones((1, d_model), jnp.float32),
        "bn1": jnp.zeros((1, d_model), jnp.float32),
        "a2": jnp.ones((1, d_model), jnp.float32),
        "bn2": jnp.zeros((1, d_model), jnp.float32),
        "wq": n(ks[0], (d_model, d_model)), "bq": n(ks[1], (1, d_model), 0.02),
        "wk": n(ks[2], (d_model, d_model)), "bk": n(ks[3], (1, d_model), 0.02),
        "wv": n(ks[4], (d_model, d_model)), "bv": n(ks[5], (1, d_model), 0.02),
        "wo": n(ks[6], (d_model, d_model)), "bo": n(ks[7], (1, d_model), 0.02),
        # conv weights stored as (taps=3, in, out); equivalent to PyTorch (out,in,3) transposed
        "w1": n(ks[8], (3, d_model, d_ff)), "bf1": n(ks[9], (1, d_ff), 0.02),
        "w2": n(ks[10], (3, d_ff, d_model)), "bf2": n(ks[11], (1, d_model), 0.02),
    }


if __name__ == "__main__":
    B, S, d_model, d_ff, heads = 2, 8, 32, 64, 4

    key = jax.random.PRNGKey(0)
    kx, kp = jax.random.split(key)
    x = jax.random.normal(kx, (B, S, d_model), jnp.float32)
    src_mask = jnp.ones((B, 1, S), jnp.float32).at[1, 0, S - 1].set(0.0)
    params = make_params(kp, d_model, d_ff)

    out = jax.block_until_ready(encoder_layer_conv(x, src_mask, params, heads=heads))
    ref = jax.block_until_ready(reference(x, src_mask, params, heads=heads))

    assert out.shape == (B, S, d_model)
    np.testing.assert_allclose(np.asarray(out), np.asarray(ref), rtol=2e-2, atol=2e-2)
    print("KERNEL_OK")
</pallas_src>

<mosaic_0001>
module attributes {stable_mosaic.version = 11 : i64} {
  func.func @encoder_layer_kernel(%arg0: i32, %arg1: memref<1x8x32xf32, #tpu.memory_space<vmem>>, %arg2: memref<1x1x8xf32, #tpu.memory_space<vmem>>, %arg3: memref<1x32xf32, #tpu.memory_space<vmem>>, %arg4: memref<1x32xf32, #tpu.memory_space<vmem>>, %arg5: memref<1x32xf32, #tpu.memory_space<vmem>>, %arg6: memref<1x32xf32, #tpu.memory_space<vmem>>, %arg7: memref<32x96xbf16, #tpu.memory_space<vmem>>, %arg8: memref<1x96xf32, #tpu.memory_space<vmem>>, %arg9: memref<32x32xbf16, #tpu.memory_space<vmem>>, %arg10: memref<1x32xf32, #tpu.memory_space<vmem>>, %arg11: memref<96x64xbf16, #tpu.memory_space<vmem>>, %arg12: memref<1x64xf32, #tpu.memory_space<vmem>>, %arg13: memref<192x32xbf16, #tpu.memory_space<vmem>>, %arg14: memref<1x32xf32, #tpu.memory_space<vmem>>, %arg15: memref<1x8x32xf32, #tpu.memory_space<vmem>>, %arg16: memref<8x32xf32, #tpu.memory_space<vmem>>) attributes {dimension_semantics = [#tpu.dimension_semantics<parallel>], iteration_bounds = array<i64: 2>, scalar_prefetch = 0 : i64, scratch_operands = 1 : i64, tpu.core_type = #tpu.core_type<tc>, window_params = [{transform_indices = @transform_0, window_bounds = array<i64: 1, 8, 32>}, {transform_indices = @transform_1, window_bounds = array<i64: 1, 1, 8>}, {pipeline_mode = #tpu.pipeline_mode<synchronous>, transform_indices = @transform_2, window_bounds = array<i64: 1, 32>}, {pipeline_mode = #tpu.pipeline_mode<synchronous>, transform_indices = @transform_3, window_bounds = array<i64: 1, 32>}, {pipeline_mode = #tpu.pipeline_mode<synchronous>, transform_indices = @transform_4, window_bounds = array<i64: 1, 32>}, {pipeline_mode = #tpu.pipeline_mode<synchronous>, transform_indices = @transform_5, window_bounds = array<i64: 1, 32>}, {pipeline_mode = #tpu.pipeline_mode<synchronous>, transform_indices = @transform_6, window_bounds = array<i64: 32, 96>}, {pipeline_mode = #tpu.pipeline_mode<synchronous>, transform_indices = @transform_7, window_bounds = array<i64: 1, 96>}, {pipeline_mode = #tpu.pipeline_mode<synchronous>, transform_indices = @transform_8, window_bounds = array<i64: 32, 32>}, {pipeline_mode = #tpu.pipeline_mode<synchronous>, transform_indices = @transform_9, window_bounds = array<i64: 1, 32>}, {pipeline_mode = #tpu.pipeline_mode<synchronous>, transform_indices = @transform_10, window_bounds = array<i64: 96, 64>}, {pipeline_mode = #tpu.pipeline_mode<synchronous>, transform_indices = @transform_11, window_bounds = array<i64: 1, 64>}, {pipeline_mode = #tpu.pipeline_mode<synchronous>, transform_indices = @transform_12, window_bounds = array<i64: 192, 32>}, {pipeline_mode = #tpu.pipeline_mode<synchronous>, transform_indices = @transform_13, window_bounds = array<i64: 1, 32>}, {transform_indices = @transform_14, window_bounds = array<i64: 1, 8, 32>}]} {
    %c0 = arith.constant 0 : index
    %c0_0 = arith.constant 0 : index
    %c0_1 = arith.constant 0 : index
    %0 = vector.load %arg1[%c0, %c0_0, %c0_1] : memref<1x8x32xf32, #tpu.memory_space<vmem>>, vector<1x8x32xf32>
    %1 = vector.shape_cast %0 : vector<1x8x32xf32> to vector<8x32xf32>
    %c0_2 = arith.constant 0 : index
    %c0_3 = arith.constant 0 : index
    %c0_4 = arith.constant 0 : index
    %2 = vector.load %arg2[%c0_2, %c0_3, %c0_4] : memref<1x1x8xf32, #tpu.memory_space<vmem>>, vector<1x1x8xf32>
    %3 = vector.shape_cast %2 : vector<1x1x8xf32> to vector<1x8xf32>
    %cst = arith.constant 0.000000e+00 : f32
    %4 = vector.broadcast %cst : f32 to vector<1x8xf32>
    %5 = arith.cmpf oeq, %3, %4 : vector<1x8xf32>
    %cst_5 = arith.constant -1.000000e+09 : f32
    %cst_6 = arith.constant 0.000000e+00 : f32
    %6 = vector.broadcast %cst_5 : f32 to vector<1x8xf32>
    %7 = vector.broadcast %cst_6 : f32 to vector<1x8xf32>
    %8 = arith.select %5, %6, %7 : vector<1x8xi1>, vector<1x8xf32>
    %c0_7 = arith.constant 0 : index
    %c0_8 = arith.constant 0 : index
    %9 = vector.load %arg3[%c0_7, %c0_8] : memref<1x32xf32, #tpu.memory_space<vmem>>, vector<1x32xf32>
    %c0_9 = arith.constant 0 : index
    %c0_10 = arith.constant 0 : index
    %10 = vector.load %arg4[%c0_9, %c0_10] : memref<1x32xf32, #tpu.memory_space<vmem>>, vector<1x32xf32>
    %cst_11 = arith.constant dense<0.000000e+00> : vector<8xf32>
    %11 = vector.multi_reduction <add>, %1, %cst_11 [1] : vector<8x32xf32> to vector<8xf32>
    %12 = vector.shape_cast %11 : vector<8xf32> to vector<8x1xf32>
    %cst_12 = arith.constant 3.200000e+01 : f32
    %13 = vector.broadcast %cst_12 : f32 to vector<8x1xf32>
    %14 = arith.divf %12, %13 : vector<8x1xf32>
    %15 = vector.broadcast %14 : vector<8x1xf32> to vector<8x32xf32>
    %16 = arith.subf %1, %15 : vector<8x32xf32>
    %17 = arith.mulf %16, %16 : vector<8x32xf32>
    %cst_13 = arith.constant dense<0.000000e+00> : vector<8xf32>
    %18 = vector.multi_reduction <add>, %17, %cst_13 [1] : vector<8x32xf32> to vector<8xf32>
    %19 = vector.shape_cast %18 : vector<8xf32> to vector<8x1xf32>
    %cst_14 = arith.constant 0.0322580636 : f32
    %20 = vector.broadcast %cst_14 : f32 to vector<8x1xf32>
    %21 = arith.mulf %19, %20 : vector<8x1xf32>
    %22 = math.sqrt %21 : vector<8x1xf32>
    %cst_15 = arith.constant 9.99999997E-7 : f32
    %23 = vector.broadcast %cst_15 : f32 to vector<8x1xf32>
    %24 = arith.addf %22, %23 : vector<8x1xf32>
    %25 = tpu.reciprocal %24 {approx = true} : vector<8x1xf32> -> vector<8x1xf32>
    %26 = vector.broadcast %9 : vector<1x32xf32> to vector<8x32xf32>
    %27 = arith.mulf %26, %16 : vector<8x32xf32>
    %28 = vector.broadcast %25 : vector<8x1xf32> to vector<8x32xf32>
    %29 = arith.mulf %27, %28 : vector<8x32xf32>
    %30 = vector.broadcast %10 : vector<1x32xf32> to vector<8x32xf32>
    %31 = arith.addf %29, %30 : vector<8x32xf32>
    %32 = arith.truncf %31 : vector<8x32xf32> to vector<8x32xbf16>
    %c0_16 = arith.constant 0 : index
    %c0_17 = arith.constant 0 : index
    %33 = vector.load %arg7[%c0_16, %c0_17] : memref<32x96xbf16, #tpu.memory_space<vmem>>, vector<32x96xbf16>
    %cst_18 = arith.constant dense<0.000000e+00> : vector<8x96xf32>
    %34 = tpu.matmul %32, %33, %cst_18 {dimension_numbers = #tpu.dot_dimension_numbers<[1], [0], [0], [1], [0, 0, 1, 1], [], []>} : vector<8x32xbf16>, vector<32x96xbf16>, vector<8x96xf32> -> vector<8x96xf32>
    %c0_19 = arith.constant 0 : index
    %c0_20 = arith.constant 0 : index
    %35 = vector.load %arg8[%c0_19, %c0_20] : memref<1x96xf32, #tpu.memory_space<vmem>>, vector<1x96xf32>
    %36 = vector.broadcast %35 : vector<1x96xf32> to vector<8x96xf32>
    %37 = arith.addf %34, %36 : vector<8x96xf32>
    %38 = arith.truncf %37 : vector<8x96xf32> to vector<8x96xbf16>
    %cst_21 = arith.constant 8.000000e+00 : f32
    %39 = math.sqrt %cst_21 : f32
    %cst_22 = arith.constant 1.000000e+00 : f32
    %40 = arith.divf %cst_22, %39 : f32
    %41 = vector.extract_strided_slice %38 {offsets = [0, 0], sizes = [8, 8], strides = [1, 1]} : vector<8x96xbf16> to vector<8x8xbf16>
    %42 = vector.extract_strided_slice %38 {offsets = [0, 32], sizes = [8, 8], strides = [1, 1]} : vector<8x96xbf16> to vector<8x8xbf16>
    %43 = vector.extract_strided_slice %38 {offsets = [0, 64], sizes = [8, 8], strides = [1, 1]} : vector<8x96xbf16> to vector<8x8xbf16>
    %cst_23 = arith.constant dense<0.000000e+00> : vector<8x8xf32>
    %44 = tpu.matmul %41, %42, %cst_23 {dimension_numbers = #tpu.dot_dimension_numbers<[1], [1], [0], [0], [0, 0, 1, 0], [], []>} : vector<8x8xbf16>, vector<8x8xbf16>, vector<8x8xf32> -> vector<8x8xf32>
    %45 = vector.broadcast %40 : f32 to vector<8x8xf32>
    %46 = arith.mulf %44, %45 : vector<8x8xf32>
    %47 = vector.broadcast %8 : vector<1x8xf32> to vector<8x8xf32>
    %48 = arith.addf %46, %47 : vector<8x8xf32>
    %cst_24 = arith.constant dense<0xFF800000> : vector<8xf32>
    %49 = vector.multi_reduction <maximumf>, %48, %cst_24 [1] : vector<8x8xf32> to vector<8xf32>
    %50 = vector.shape_cast %49 : vector<8xf32> to vector<8x1xf32>
    %51 = vector.broadcast %50 : vector<8x1xf32> to vector<8x8xf32>
    %52 = arith.subf %48, %51 : vector<8x8xf32>
    %53 = math.exp %52 : vector<8x8xf32>
    %cst_25 = arith.constant dense<0.000000e+00> : vector<8xf32>
    %54 = vector.multi_reduction <add>, %53, %cst_25 [1] : vector<8x8xf32> to vector<8xf32>
    %55 = vector.shape_cast %54 : vector<8xf32> to vector<8x1xf32>
    %56 = tpu.reciprocal %55 {approx = true} : vector<8x1xf32> -> vector<8x1xf32>
    %57 = vector.broadcast %56 : vector<8x1xf32> to vector<8x8xf32>
    %58 = arith.mulf %53, %57 : vector<8x8xf32>
    %59 = arith.truncf %58 : vector<8x8xf32> to vector<8x8xbf16>
    %cst_26 = arith.constant dense<0.000000e+00> : vector<8x8xf32>
    %60 = tpu.matmul %59, %43, %cst_26 {dimension_numbers = #tpu.dot_dimension_numbers<[1], [0], [0], [1], [0, 0, 1, 1], [], []>} : vector<8x8xbf16>, vector<8x8xbf16>, vector<8x8xf32> -> vector<8x8xf32>
    %c0_27 = arith.constant 0 : index
    %c0_28 = arith.constant 0 : index
    %61 = vector.load %arg16[%c0_27, %c0_28] : memref<8x32xf32, #tpu.memory_space<vmem>>, vector<8x8xf32>
    tpu.vector_store %arg16[%c0_27, %c0_28], %60 {strides = array<i32>} : memref<8x32xf32, #tpu.memory_space<vmem>>, vector<8x8xf32>,
    %62 = vector.extract_strided_slice %38 {offsets = [0, 8], sizes = [8, 8], strides = [1, 1]} : vector<8x96xbf16> to vector<8x8xbf16>
    %63 = vector.extract_strided_slice %38 {offsets = [0, 40], sizes = [8, 8], strides = [1, 1]} : vector<8x96xbf16> to vector<8x8xbf16>
    %64 = vector.extract_strided_slice %38 {offsets = [0, 72], sizes = [8, 8], strides = [1, 1]} : vector<8x96xbf16> to vector<8x8xbf16>
    %cst_29 = arith.constant dense<0.000000e+00> : vector<8x8xf32>
    %65 = tpu.matmul %62, %63, %cst_29 {dimension_numbers = #tpu.dot_dimension_numbers<[1], [1], [0], [0], [0, 0, 1, 0], [], []>} : vector<8x8xbf16>, vector<8x8xbf16>, vector<8x8xf32> -> vector<8x8xf32>
    %66 = vector.broadcast %40 : f32 to vector<8x8xf32>
    %67 = arith.mulf %65, %66 : vector<8x8xf32>
    %68 = vector.broadcast %8 : vector<1x8xf32> to vector<8x8xf32>
    %69 = arith.addf %67, %68 : vector<8x8xf32>
    %cst_30 = arith.constant dense<0xFF800000> : vector<8xf32>
    %70 = vector.multi_reduction <maximumf>, %69, %cst_30 [1] : vector<8x8xf32> to vector<8xf32>
    %71 = vector.shape_cast %70 : vector<8xf32> to vector<8x1xf32>
    %72 = vector.broadcast %71 : vector<8x1xf32> to vector<8x8xf32>
    %73 = arith.subf %69, %72 : vector<8x8xf32>
    %74 = math.exp %73 : vector<8x8xf32>
    %cst_31 = arith.constant dense<0.000000e+00> : vector<8xf32>
    %75 = vector.multi_reduction <add>, %74, %cst_31 [1] : vector<8x8xf32> to vector<8xf32>
    %76 = vector.shape_cast %75 : vector<8xf32> to vector<8x1xf32>
    %77 = tpu.reciprocal %76 {approx = true} : vector<8x1xf32> -> vector<8x1xf32>
    %78 = vector.broadcast %77 : vector<8x1xf32> to vector<8x8xf32>
    %79 = arith.mulf %74, %78 : vector<8x8xf32>
    %80 = arith.truncf %79 : vector<8x8xf32> to vector<8x8xbf16>
    %cst_32 = arith.constant dense<0.000000e+00> : vector<8x8xf32>
    %81 = tpu.matmul %80, %64, %cst_32 {dimension_numbers = #tpu.dot_dimension_numbers<[1], [0], [0], [1], [0, 0, 1, 1], [], []>} : vector<8x8xbf16>, vector<8x8xbf16>, vector<8x8xf32> -> vector<8x8xf32>
    %c0_33 = arith.constant 0 : index
    %c8 = arith.constant 8 : index
    %82 = vector.load %arg16[%c0_33, %c8] : memref<8x32xf32, #tpu.memory_space<vmem>>, vector<8x8xf32>
    tpu.vector_store %arg16[%c0_33, %c8], %81 {strides = array<i32>} : memref<8x32xf32, #tpu.memory_space<vmem>>, vector<8x8xf32>,
    %83 = vector.extract_strided_slice %38 {offsets = [0, 16], sizes = [8, 8], strides = [1, 1]} : vector<8x96xbf16> to vector<8x8xbf16>
    %84 = vector.extract_strided_slice %38 {offsets = [0, 48], sizes = [8, 8], strides = [1, 1]} : vector<8x96xbf16> to vector<8x8xbf16>
    %85 = vector.extract_strided_slice %38 {offsets = [0, 80], sizes = [8, 8], strides = [1, 1]} : vector<8x96xbf16> to vector<8x8xbf16>
    %cst_34 = arith.constant dense<0.000000e+00> : vector<8x8xf32>
    %86 = tpu.matmul %83, %84, %cst_34 {dimension_numbers = #tpu.dot_dimension_numbers<[1], [1], [0], [0], [0, 0, 1, 0], [], []>} : vector<8x8xbf16>, vector<8x8xbf16>, vector<8x8xf32> -> vector<8x8xf32>
    %87 = vector.broadcast %40 : f32 to vector<8x8xf32>
    %88 = arith.mulf %86, %87 : vector<8x8xf32>
    %89 = vector.broadcast %8 : vector<1x8xf32> to vector<8x8xf32>
    %90 = arith.addf %88, %89 : vector<8x8xf32>
    %cst_35 = arith.constant dense<0xFF800000> : vector<8xf32>
    %91 = vector.multi_reduction <maximumf>, %90, %cst_35 [1] : vector<8x8xf32> to vector<8xf32>
    %92 = vector.shape_cast %91 : vector<8xf32> to vector<8x1xf32>
    %93 = vector.broadcast %92 : vector<8x1xf32> to vector<8x8xf32>
    %94 = arith.subf %90, %93 : vector<8x8xf32>
    %95 = math.exp %94 : vector<8x8xf32>
    %cst_36 = arith.constant dense<0.000000e+00> : vector<8xf32>
    %96 = vector.multi_reduction <add>, %95, %cst_36 [1] : vector<8x8xf32> to vector<8xf32>
    %97 = vector.shape_cast %96 : vector<8xf32> to vector<8x1xf32>
    %98 = tpu.reciprocal %97 {approx = true} : vector<8x1xf32> -> vector<8x1xf32>
    %99 = vector.broadcast %98 : vector<8x1xf32> to vector<8x8xf32>
    %100 = arith.mulf %95, %99 : vector<8x8xf32>
    %101 = arith.truncf %100 : vector<8x8xf32> to vector<8x8xbf16>
    %cst_37 = arith.constant dense<0.000000e+00> : vector<8x8xf32>
    %102 = tpu.matmul %101, %85, %cst_37 {dimension_numbers = #tpu.dot_dimension_numbers<[1], [0], [0], [1], [0, 0, 1, 1], [], []>} : vector<8x8xbf16>, vector<8x8xbf16>, vector<8x8xf32> -> vector<8x8xf32>
    %c0_38 = arith.constant 0 : index
    %c16 = arith.constant 16 : index
    %103 = vector.load %arg16[%c0_38, %c16] : memref<8x32xf32, #tpu.memory_space<vmem>>, vector<8x8xf32>
    tpu.vector_store %arg16[%c0_38, %c16], %102 {strides = array<i32>} : memref<8x32xf32, #tpu.memory_space<vmem>>, vector<8x8xf32>,
    %104 = vector.extract_strided_slice %38 {offsets = [0, 24], sizes = [8, 8], strides = [1, 1]} : vector<8x96xbf16> to vector<8x8xbf16>
    %105 = vector.extract_strided_slice %38 {offsets = [0, 56], sizes = [8, 8], strides = [1, 1]} : vector<8x96xbf16> to vector<8x8xbf16>
    %106 = vector.extract_strided_slice %38 {offsets = [0, 88], sizes = [8, 8], strides = [1, 1]} : vector<8x96xbf16> to vector<8x8xbf16>
    %cst_39 = arith.constant dense<0.000000e+00> : vector<8x8xf32>
    %107 = tpu.matmul %104, %105, %cst_39 {dimension_numbers = #tpu.dot_dimension_numbers<[1], [1], [0], [0], [0, 0, 1, 0], [], []>} : vector<8x8xbf16>, vector<8x8xbf16>, vector<8x8xf32> -> vector<8x8xf32>
    %108 = vector.broadcast %40 : f32 to vector<8x8xf32>
    %109 = arith.mulf %107, %108 : vector<8x8xf32>
    %110 = vector.broadcast %8 : vector<1x8xf32> to vector<8x8xf32>
    %111 = arith.addf %109, %110 : vector<8x8xf32>
    %cst_40 = arith.constant dense<0xFF800000> : vector<8xf32>
    %112 = vector.multi_reduction <maximumf>, %111, %cst_40 [1] : vector<8x8xf32> to vector<8xf32>
    %113 = vector.shape_cast %112 : vector<8xf32> to vector<8x1xf32>
    %114 = vector.broadcast %113 : vector<8x1xf32> to vector<8x8xf32>
    %115 = arith.subf %111, %114 : vector<8x8xf32>
    %116 = math.exp %115 : vector<8x8xf32>
    %cst_41 = arith.constant dense<0.000000e+00> : vector<8xf32>
    %117 = vector.multi_reduction <add>, %116, %cst_41 [1] : vector<8x8xf32> to vector<8xf32>
    %118 = vector.shape_cast %117 : vector<8xf32> to vector<8x1xf32>
    %119 = tpu.reciprocal %118 {approx = true} : vector<8x1xf32> -> vector<8x1xf32>
    %120 = vector.broadcast %119 : vector<8x1xf32> to vector<8x8xf32>
    %121 = arith.mulf %116, %120 : vector<8x8xf32>
    %122 = arith.truncf %121 : vector<8x8xf32> to vector<8x8xbf16>
    %cst_42 = arith.constant dense<0.000000e+00> : vector<8x8xf32>
    %123 = tpu.matmul %122, %106, %cst_42 {dimension_numbers = #tpu.dot_dimension_numbers<[1], [0], [0], [1], [0, 0, 1, 1], [], []>} : vector<8x8xbf16>, vector<8x8xbf16>, vector<8x8xf32> -> vector<8x8xf32>
    %c0_43 = arith.constant 0 : index
    %c24 = arith.constant 24 : index
    %124 = vector.load %arg16[%c0_43, %c24] : memref<8x32xf32, #tpu.memory_space<vmem>>, vector<8x8xf32>
    tpu.vector_store %arg16[%c0_43, %c24], %123 {strides = array<i32>} : memref<8x32xf32, #tpu.memory_space<vmem>>, vector<8x8xf32>,
    %c0_44 = arith.constant 0 : index
    %c0_45 = arith.constant 0 : index
    %125 = vector.load %arg16[%c0_44, %c0_45] : memref<8x32xf32, #tpu.memory_space<vmem>>, vector<8x32xf32>
    %126 = arith.truncf %125 : vector<8x32xf32> to vector<8x32xbf16>
    %c0_46 = arith.constant 0 : index
    %c0_47 = arith.constant 0 : index
    %127 = vector.load %arg9[%c0_46, %c0_47] : memref<32x32xbf16, #tpu.memory_space<vmem>>, vector<32x32xbf16>
    %cst_48 = arith.constant dense<0.000000e+00> : vector<8x32xf32>
    %128 = tpu.matmul %126, %127, %cst_48 {dimension_numbers = #tpu.dot_dimension_numbers<[1], [0], [0], [1], [0, 0, 1, 1], [], []>} : vector<8x32xbf16>, vector<32x32xbf16>, vector<8x32xf32> -> vector<8x32xf32>
    %c0_49 = arith.constant 0 : index
    %c0_50 = arith.constant 0 : index
    %129 = vector.load %arg10[%c0_49, %c0_50] : memref<1x32xf32, #tpu.memory_space<vmem>>, vector<1x32xf32>
    %130 = vector.broadcast %129 : vector<1x32xf32> to vector<8x32xf32>
    %131 = arith.addf %128, %130 : vector<8x32xf32>
    %132 = arith.addf %131, %131 : vector<8x32xf32>
    %c0_51 = arith.constant 0 : index
    %c0_52 = arith.constant 0 : index
    %133 = vector.load %arg5[%c0_51, %c0_52] : memref<1x32xf32, #tpu.memory_space<vmem>>, vector<1x32xf32>
    %c0_53 = arith.constant 0 : index
    %c0_54 = arith.constant 0 : index
    %134 = vector.load %arg6[%c0_53, %c0_54] : memref<1x32xf32, #tpu.memory_space<vmem>>, vector<1x32xf32>
    %cst_55 = arith.constant dense<0.000000e+00> : vector<8xf32>
    %135 = vector.multi_reduction <add>, %132, %cst_55 [1] : vector<8x32xf32> to vector<8xf32>
    %136 = vector.shape_cast %135 : vector<8xf32> to vector<8x1xf32>
    %cst_56 = arith.constant 3.200000e+01 : f32
    %137 = vector.broadcast %cst_56 : f32 to vector<8x1xf32>
    %138 = arith.divf %136, %137 : vector<8x1xf32>
    %139 = vector.broadcast %138 : vector<8x1xf32> to vector<8x32xf32>
    %140 = arith.subf %132, %139 : vector<8x32xf32>
    %141 = arith.mulf %140, %140 : vector<8x32xf32>
    %cst_57 = arith.constant dense<0.000000e+00> : vector<8xf32>
    %142 = vector.multi_reduction <add>, %141, %cst_57 [1] : vector<8x32xf32> to vector<8xf32>
    %143 = vector.shape_cast %142 : vector<8xf32> to vector<8x1xf32>
    %cst_58 = arith.constant 0.0322580636 : f32
    %144 = vector.broadcast %cst_58 : f32 to vector<8x1xf32>
    %145 = arith.mulf %143, %144 : vector<8x1xf32>
    %146 = math.sqrt %145 : vector<8x1xf32>
    %cst_59 = arith.constant 9.99999997E-7 : f32
    %147 = vector.broadcast %cst_59 : f32 to vector<8x1xf32>
    %148 = arith.addf %146, %147 : vector<8x1xf32>
    %149 = tpu.reciprocal %148 {approx = true} : vector<8x1xf32> -> vector<8x1xf32>
    %150 = vector.broadcast %133 : vector<1x32xf32> to vector<8x32xf32>
    %151 = arith.mulf %150, %140 : vector<8x32xf32>
    %152 = vector.broadcast %149 : vector<8x1xf32> to vector<8x32xf32>
    %153 = arith.mulf %151, %152 : vector<8x32xf32>
    %154 = vector.broadcast %134 : vector<1x32xf32> to vector<8x32xf32>
    %155 = arith.addf %153, %154 : vector<8x32xf32>
    %156 = arith.truncf %155 : vector<8x32xf32> to vector<8x32xbf16>
    %cst_60 = arith.constant 0.000000e+00 : bf16
    %157 = vector.broadcast %cst_60 : bf16 to vector<1x32xbf16>
    %158 = vector.extract_strided_slice %156 {offsets = [0, 0], sizes = [7, 32], strides = [1, 1]} : vector<8x32xbf16> to vector<7x32xbf16>
    %159 = tpu.concatenate %157, %158 in 0 : vector<1x32xbf16>, vector<7x32xbf16> -> vector<8x32xbf16>
    %160 = vector.extract_strided_slice %156 {offsets = [1, 0], sizes = [7, 32], strides = [1, 1]} : vector<8x32xbf16> to vector<7x32xbf16>
    %161 = tpu.concatenate %160, %157 in 0 : vector<7x32xbf16>, vector<1x32xbf16> -> vector<8x32xbf16>
    %162 = tpu.concatenate %159, %156, %161 in 1 : vector<8x32xbf16>, vector<8x32xbf16>, vector<8x32xbf16> -> vector<8x96xbf16>
    %c0_61 = arith.constant 0 : index
    %c0_62 = arith.constant 0 : index
    %163 = vector.load %arg11[%c0_61, %c0_62] : memref<96x64xbf16, #tpu.memory_space<vmem>>, vector<96x64xbf16>
    %cst_63 = arith.constant dense<0.000000e+00> : vector<8x64xf32>
    %164 = tpu.matmul %162, %163, %cst_63 {dimension_numbers = #tpu.dot_dimension_numbers<[1], [0], [0], [1], [0, 0, 1, 1], [], []>} : vector<8x96xbf16>, vector<96x64xbf16>, vector<8x64xf32> -> vector<8x64xf32>
    %c0_64 = arith.constant 0 : index
    %c0_65 = arith.constant 0 : index
    %165 = vector.load %arg12[%c0_64, %c0_65] : memref<1x64xf32, #tpu.memory_space<vmem>>, vector<1x64xf32>
    %166 = vector.broadcast %165 : vector<1x64xf32> to vector<8x64xf32>
    %167 = arith.addf %164, %166 : vector<8x64xf32>
    %cst_66 = arith.constant 0.000000e+00 : f32
    %168 = vector.broadcast %cst_66 : f32 to vector<8x64xf32>
    %169 = arith.maximumf %167, %168 : vector<8x64xf32>
    %170 = arith.truncf %169 : vector<8x64xf32> to vector<8x64xbf16>
    %cst_67 = arith.constant 0.000000e+00 : bf16
    %171 = vector.broadcast %cst_67 : bf16 to vector<1x64xbf16>
    %172 = vector.extract_strided_slice %170 {offsets = [0, 0], sizes = [7, 64], strides = [1, 1]} : vector<8x64xbf16> to vector<7x64xbf16>
    %173 = tpu.concatenate %171, %172 in 0 : vector<1x64xbf16>, vector<7x64xbf16> -> vector<8x64xbf16>
    %174 = vector.extract_strided_slice %170 {offsets = [1, 0], sizes = [7, 64], strides = [1, 1]} : vector<8x64xbf16> to vector<7x64xbf16>
    %175 = tpu.concatenate %174, %171 in 0 : vector<7x64xbf16>, vector<1x64xbf16> -> vector<8x64xbf16>
    %176 = tpu.concatenate %173, %170, %175 in 1 : vector<8x64xbf16>, vector<8x64xbf16>, vector<8x64xbf16> -> vector<8x192xbf16>
    %c0_68 = arith.constant 0 : index
    %c0_69 = arith.constant 0 : index
    %177 = vector.load %arg13[%c0_68, %c0_69] : memref<192x32xbf16, #tpu.memory_space<vmem>>, vector<192x32xbf16>
    %cst_70 = arith.constant dense<0.000000e+00> : vector<8x32xf32>
    %178 = tpu.matmul %176, %177, %cst_70 {dimension_numbers = #tpu.dot_dimension_numbers<[1], [0], [0], [1], [0, 0, 1, 1], [], []>} : vector<8x192xbf16>, vector<192x32xbf16>, vector<8x32xf32> -> vector<8x32xf32>
    %c0_71 = arith.constant 0 : index
    %c0_72 = arith.constant 0 : index
    %179 = vector.load %arg14[%c0_71, %c0_72] : memref<1x32xf32, #tpu.memory_space<vmem>>, vector<1x32xf32>
    %180 = vector.broadcast %179 : vector<1x32xf32> to vector<8x32xf32>
    %181 = arith.addf %178, %180 : vector<8x32xf32>
    %182 = arith.addf %132, %181 : vector<8x32xf32>
    %c0_73 = arith.constant 0 : index
    %c0_74 = arith.constant 0 : index
    %c0_75 = arith.constant 0 : index
    %183 = vector.load %arg15[%c0_73, %c0_74, %c0_75] : memref<1x8x32xf32, #tpu.memory_space<vmem>>, vector<1x8x32xf32>
    %184 = vector.shape_cast %183 : vector<1x8x32xf32> to vector<8x32xf32>
    %185 = vector.shape_cast %182 : vector<8x32xf32> to vector<1x8x32xf32>
    tpu.vector_store %arg15[%c0_73, %c0_74, %c0_75], %185 {strides = array<i32>} : memref<1x8x32xf32, #tpu.memory_space<vmem>>, vector<1x8x32xf32>,
    return
  }
  func.func @transform_0(%arg0: i32) -> (i32, i32, i32) {
    %c0_i32 = arith.constant 0 : i32
    %c0_i32_0 = arith.constant 0 : i32
    %c0_i32_1 = arith.constant 0 : i32
    return %arg0, %c0_i32, %c0_i32_0 : i32, i32, i32
  }
  func.func @transform_1(%arg0: i32) -> (i32, i32, i32) {
    %c0_i32 = arith.constant 0 : i32
    %c0_i32_0 = arith.constant 0 : i32
    %c0_i32_1 = arith.constant 0 : i32
    return %arg0, %c0_i32, %c0_i32_0 : i32, i32, i32
  }
  func.func @transform_2(%arg0: i32) -> (i32, i32) {
    %c0_i32 = arith.constant 0 : i32
    %c0_i32_0 = arith.constant 0 : i32
    %c0_i32_1 = arith.constant 0 : i32
    return %c0_i32, %c0_i32_0 : i32, i32
  }
  func.func @transform_3(%arg0: i32) -> (i32, i32) {
    %c0_i32 = arith.constant 0 : i32
    %c0_i32_0 = arith.constant 0 : i32
    %c0_i32_1 = arith.constant 0 : i32
    return %c0_i32, %c0_i32_0 : i32, i32
  }
  func.func @transform_4(%arg0: i32) -> (i32, i32) {
    %c0_i32 = arith.constant 0 : i32
    %c0_i32_0 = arith.constant 0 : i32
    %c0_i32_1 = arith.constant 0 : i32
    return %c0_i32, %c0_i32_0 : i32, i32
  }
  func.func @transform_5(%arg0: i32) -> (i32, i32) {
    %c0_i32 = arith.constant 0 : i32
    %c0_i32_0 = arith.constant 0 : i32
    %c0_i32_1 = arith.constant 0 : i32
    return %c0_i32, %c0_i32_0 : i32, i32
  }
  func.func @transform_6(%arg0: i32) -> (i32, i32) {
    %c0_i32 = arith.constant 0 : i32
    %c0_i32_0 = arith.constant 0 : i32
    %c0_i32_1 = arith.constant 0 : i32
    return %c0_i32, %c0_i32_0 : i32, i32
  }
  func.func @transform_7(%arg0: i32) -> (i32, i32) {
    %c0_i32 = arith.constant 0 : i32
    %c0_i32_0 = arith.constant 0 : i32
    %c0_i32_1 = arith.constant 0 : i32
    return %c0_i32, %c0_i32_0 : i32, i32
  }
  func.func @transform_8(%arg0: i32) -> (i32, i32) {
    %c0_i32 = arith.constant 0 : i32
    %c0_i32_0 = arith.constant 0 : i32
    %c0_i32_1 = arith.constant 0 : i32
    return %c0_i32, %c0_i32_0 : i32, i32
  }
  func.func @transform_9(%arg0: i32) -> (i32, i32) {
    %c0_i32 = arith.constant 0 : i32
    %c0_i32_0 = arith.constant 0 : i32
    %c0_i32_1 = arith.constant 0 : i32
    return %c0_i32, %c0_i32_0 : i32, i32
  }
  func.func @transform_10(%arg0: i32) -> (i32, i32) {
    %c0_i32 = arith.constant 0 : i32
    %c0_i32_0 = arith.constant 0 : i32
    %c0_i32_1 = arith.constant 0 : i32
    return %c0_i32, %c0_i32_0 : i32, i32
  }
  func.func @transform_11(%arg0: i32) -> (i32, i32) {
    %c0_i32 = arith.constant 0 : i32
    %c0_i32_0 = arith.constant 0 : i32
    %c0_i32_1 = arith.constant 0 : i32
    return %c0_i32, %c0_i32_0 : i32, i32
  }
  func.func @transform_12(%arg0: i32) -> (i32, i32) {
    %c0_i32 = arith.constant 0 : i32
    %c0_i32_0 = arith.constant 0 : i32
    %c0_i32_1 = arith.constant 0 : i32
    return %c0_i32, %c0_i32_0 : i32, i32
  }
  func.func @transform_13(%arg0: i32) -> (i32, i32) {
    %c0_i32 = arith.constant 0 : i32
    %c0_i32_0 = arith.constant 0 : i32
    %c0_i32_1 = arith.constant 0 : i32
    return %c0_i32, %c0_i32_0 : i32, i32
  }
  func.func @transform_14(%arg0: i32) -> (i32, i32, i32) {
    %c0_i32 = arith.constant 0 : i32
    %c0_i32_0 = arith.constant 0 : i32
    %c0_i32_1 = arith.constant 0 : i32
    return %arg0, %c0_i32, %c0_i32_0 : i32, i32, i32
  }
}

</mosaic_0001>

<bundles_post_ra>
// kernel: tpu_custom_call.1
= control target key start
LH: loop header
LB: loop body
LE: loop exit
PB: predicated region body
PF: predicated region fallthrough
CT: control target
= control target key end

     0   :  { %s3553_s0 = inlined_call_operand.hbm [shape: f32[2,8,32], index: 0, kind: input, shape index: {}]   ;;  %s3554_s1 = inlined_call_operand.hbm [shape: f32[2,1,8], index: 1, kind: input, shape index: {}]   ;;  %s3555_s2 = inlined_call_operand.hbm [shape: f32[1,32], index: 2, kind: input, shape index: {}]   ;;  %s3556_s3 = inlined_call_operand.hbm [shape: f32[1,32], index: 3, kind: input, shape index: {}]   ;;  %s3557_s4 = inlined_call_operand.hbm [shape: f32[1,32], index: 4, kind: input, shape index: {}]   ;;  %s3558_s5 = inlined_call_operand.hbm [shape: f32[1,32], index: 5, kind: input, shape index: {}]   ;;  %s3559_s6 = inlined_call_operand.hbm [shape: bf16[32,96], index: 6, kind: input, shape index: {}]   ;;  %s3560_s7 = inlined_call_operand.hbm [shape: f32[1,96], index: 7, kind: input, shape index: {}]   ;;  %s3561_s8 = inlined_call_operand.hbm [shape: bf16[32,32], index: 8, kind: input, shape index: {}]   ;;  %s3562_s9 = inlined_call_operand.hbm [shape: f32[1,32], index: 9, kind: input, shape index: {}]   ;;  %s3563_s10 = inlined_call_operand.hbm [shape: bf16[96,64], index: 10, kind: input, shape index: {}]   ;;  %s3564_s11 = inlined_call_operand.hbm [shape: f32[1,64], index: 11, kind: input, shape index: {}]   ;;  %s3565_s12 = inlined_call_operand.hbm [shape: bf16[192,32], index: 12, kind: input, shape index: {}]   ;;  %s3566_s13 = inlined_call_operand.hbm [shape: f32[1,32], index: 13, kind: input, shape index: {}]   ;;  %s3567_s14 = inlined_call_operand.hbm [shape: f32[2,8,32], index: 14, kind: output, shape index: {}]  }
   0x1   :  { %3580 = sst [smem:[#allocation39_spill]] %s3553_s0 }
   0x2   :  { %3581 = sst [smem:[#allocation40_spill]] %s3554_s1 }
   0x3   :  { %3582 = sst [smem:[#allocation41_spill]] %s3555_s2 }
   0x4   :  { %3583 = sst [smem:[#allocation42_spill]] %s3556_s3 }
   0x5   :  { %3584 = sst [smem:[#allocation43_spill]] %s3557_s4 }
   0x6   :  { %3585 = sst [smem:[#allocation44_spill]] %s3558_s5 }
   0x7   :  { %3586 = sst [smem:[#allocation45_spill]] %s3559_s6 }
   0x8   :  { %3587 = sst [smem:[#allocation46_spill]] %s3567_s14 }
   0x9   :  { %19 = vsyncpa [#allocation4], 0 }
   0xa   :  { %21 = vsyncpa [#allocation4 + $0x1], 0 }
   0xb   :  { %22 = vsyncpa [#allocation7], 0 }
   0xc   :  { %24 = vsyncpa [#allocation7 + $0x1], 0 }
   0xd   :  { %25 = vsyncpa [#allocation10], 0 }
   0xe   :  { %26 = vsyncpa [#allocation13], 0 }
   0xf   :  { %27 = vsyncpa [#allocation16], 0 }
  0x10   :  { %28 = vsyncpa [#allocation19], 0 }
  0x11   :  { %29 = vsyncpa [#allocation22], 0 }
  0x12   :  { %30 = vsyncpa [#allocation25], 0 }
  0x13   :  { %31 = vsyncpa [#allocation5], 0 }
  0x14   :  { %33 = vsyncpa [#allocation5 + $0x1], 0  ;;  %s2915_s29 = smov 0   ;;  %s2917_s30 = smov 0  }
  0x15   :  { %s2919_s15 = smov 0   ;;  %s2921_s16 = smov 0  }
  0x16 LB: > { %s2805_s17 = smov [#allocation8]   ;;  %s2936_s19 = sadd.s32 4294967295, %s2803_s16   ;;  %s2803_s16 = sphi %s2921_s16, %s3637_s16   ;;  %s2799_s15 = sphi %s2919_s15, %s3636_s15   ;;  %s2795_s30 = sphi %s2917_s30, %s3635_s30   ;;  %s2791_s29 = sphi %s2915_s29, %s3634_s29  }
  0x17   : > { %s387_s18 = sshll.u32 %s2805_s17, 4  ;;  %3588 = sst [smem:[#allocation37_spill]] %s2936_s19  ;;  %s2941_s18 = int_to_ptr.vmem [resolvable:$true] %s387_s18 }
  0x18   : > { %p1884_p0 = scmp.ge.s32.totalorder %s2803_s16, 1  ;;  %p3575_p1 = scmp.eq.s32.totalorder %s2936_s19, 0 }
  0x19   : > { %p374_p2 = scmp.lt.s32.totalorder %s2803_s16, 3  ;;  %s2806_s21 = smov [#allocation9]  }
  0x1a   : > { %s398_s22 = sshll.u32 %s2806_s21, 4  ;;  %s2807_s23 = smov [#allocation12]   ;;  %s2950_s22 = int_to_ptr.vmem [resolvable:$true] %s398_s22 }
  0x1b   : > { %p2943_p3 = pnand %p1884_p0, %p374_p2  ;;  %s420_s24 = sshll.u32 %s2807_s23, 4  ;;  %s2958_s24 = int_to_ptr.vmem [resolvable:$true] %s420_s24 }
  0x1c   : > { %s2808_s26 = smov [#allocation15]   ;;  %s3592_s2 = sld [smem:[#allocation41_spill]] }
  0x1d   : > { %s3589_s20 = scalar_select %p2943_p3, 1, 0 }
  0x1e   : > { %p2125_p5 = pneg %p2943_p3  ;;  %s2960_s27 = sshll.u32 %s2808_s26, 4  ;;  %s445_s27 = int_to_ptr.vmem [resolvable:$true] %s2960_s27 }
  0x1f   : > { %3590 = sst [smem:[#allocation38_spill]] %s3589_s20 }
  0x20   : > { %p2954_p6 = pnand %p2125_p5, %p3575_p1 }
  0x22   : > { %s2309_s14 = scalar_lea.hbm %s3592_s2, 16  ;;  %p2970_p8 = pneg %p2954_p6 }
  0x23   : > { %p2310_p7 = scmp.ne.s32.totalorder %s3592_s2, %s2309_s14  ;;  %p2316_p11 = scmp.lt.u32.totalorder %s2309_s14, %s3592_s2 }
  0x25   : > { %p2312_p9 = pnand %p2970_p8, %p2310_p7 }
  0x27   : > { %p2313_p10 = pneg %p2312_p9 }
  0x29   : > { %p2318_p12 = pnand %p2316_p11, %p2313_p10 }
  0x2b   : > { %2321 = shalt.err (!%p2318_p12)
}
  0x2c   : > { %s2322_s20 = scalar_lea.vmem %s2941_s18, 16  ;;  %s2329_s28 = scalar_lea.vmem %s2941_s18, 32 }
  0x2d   : > { %p2323_p13 = scmp.ne.s32.totalorder %s2941_s18, %s2322_s20  ;;  %p2330_p5 = scmp.lt.s32.totalorder %s2941_s18, %s2941_s18 }
  0x2e   : > { %p2331_p7 = scmp.lt.s32.totalorder %s2329_s28, %s2322_s20 }
  0x2f   : > { %p2325_p0 = pnand %p2323_p13, %p2970_p8 }
  0x30   : > { %p2332_p9 = por %p2331_p7, %p2330_p5 }
  0x31   : > { %p2326_p2 = pneg %p2325_p0 }
  0x33   : > { %p2333_p4 = pnand %p2332_p9, %p2326_p2 }
  0x35   : > { %2336 = shalt.err (!%p2333_p4)
}
  0x36   : > { %2128 = dma.hbm_to_vmem [thread:$0]  (!%p2954_p6), %s3592_s2, 16, %s2941_s18, [#allocation7]  }
  0x37   : > { %s3594_s3 = sld [smem:[#allocation42_spill]] }
  0x3d   : > { %s2337_s26 = scalar_lea.hbm %s3594_s3, 16 }
  0x3e   : > { %p2338_p10 = scmp.ne.s32.totalorder %s3594_s3, %s2337_s26  ;;  %p2344_p4 = scmp.lt.u32.totalorder %s2337_s26, %s3594_s3 }
  0x40   : > { %p2340_p11 = pnand %p2338_p10, %p2970_p8 }
  0x42   : > { %p2341_p12 = pneg %p2340_p11 }
  0x44   : > { %p2346_p13 = pnand %p2344_p4, %p2341_p12 }
  0x46   : > { %2349 = shalt.err (!%p2346_p13)
}
  0x47   : > { %s2350_s18 = scalar_lea.vmem %s2950_s22, 16  ;;  %s2357_s0 = scalar_lea.vmem %s2950_s22, 32 }
  0x48   : > { %p2351_p0 = scmp.ne.s32.totalorder %s2950_s22, %s2350_s18  ;;  %p2358_p7 = scmp.lt.s32.totalorder %s2950_s22, %s2950_s22 }
  0x49   : > { %p2359_p9 = scmp.lt.s32.totalorder %s2357_s0, %s2350_s18 }
  0x4a   : > { %p2353_p2 = pnand %p2351_p0, %p2970_p8 }
  0x4b   : > { %p2360_p10 = por %p2359_p9, %p2358_p7 }
  0x4c   : > { %p2354_p5 = pneg %p2353_p2 }
  0x4e   : > { %p2361_p11 = pnand %p2360_p10, %p2354_p5 }
  0x50   : > { %2364 = shalt.err (!%p2361_p11)
}
  0x51   : > { %2131 = dma.hbm_to_vmem [thread:$0]  (!%p2954_p6), %s3594_s3, 16, %s2950_s22, [#allocation10]  }
  0x52   : > { %s3595_s5 = sld [smem:[#allocation44_spill]] }
  0x58   : > { %s2365_s21 = scalar_lea.hbm %s3595_s5, 16 }
  0x59   : > { %p2366_p12 = scmp.ne.s32.totalorder %s3595_s5, %s2365_s21  ;;  %p2372_p0 = scmp.lt.u32.totalorder %s2365_s21, %s3595_s5 }
  0x5b   : > { %p2368_p4 = pnand %p2366_p12, %p2970_p8 }
  0x5d   : > { %p2369_p13 = pneg %p2368_p4 }
  0x5f   : > { %p2374_p2 = pnand %p2372_p0, %p2369_p13 }
  0x61   : > { %2377 = shalt.err (!%p2374_p2)
}
  0x62   : > { %s2378_s22 = scalar_lea.vmem %s2958_s24, 16  ;;  %s2385_s0 = scalar_lea.vmem %s2958_s24, 32 }
  0x63   : > { %p2379_p5 = scmp.ne.s32.totalorder %s2958_s24, %s2378_s22  ;;  %p2386_p10 = scmp.lt.s32.totalorder %s2958_s24, %s2958_s24 }
  0x64   : > { %p2387_p11 = scmp.lt.s32.totalorder %s2385_s0, %s2378_s22 }
  0x65   : > { %p2381_p7 = pnand %p2379_p5, %p2970_p8 }
  0x66   : > { %p2388_p12 = por %p2387_p11, %p2386_p10 }
  0x67   : > { %p2382_p9 = pneg %p2381_p7 }
  0x69   : > { %p2389_p4 = pnand %p2388_p12, %p2382_p9 }
  0x6b   : > { %2392 = shalt.err (!%p2389_p4)
}
  0x6c   : > { %2137 = dma.hbm_to_vmem [thread:$0]  (!%p2954_p6), %s3595_s5, 16, %s2958_s24, [#allocation13]  }
  0x6d   : > { %s2809_s14 = smov [#allocation18]   ;;  %s2393_s20 = scalar_lea.hbm %s3560_s7, 16 }
  0x6e   : > { %s468_s17 = sshll.u32 %s2809_s14, 4  ;;  %p2394_p13 = scmp.ne.s32.totalorder %s3560_s7, %s2393_s20  ;;  %s469_s17 = int_to_ptr.vmem [resolvable:$true] %s468_s17 }
  0x6f   : > { %p2400_p5 = scmp.lt.u32.totalorder %s2393_s20, %s3560_s7 }
  0x70   : > { %p2396_p0 = pnand %p2394_p13, %p2970_p8 }
  0x72   : > { %p2397_p2 = pneg %p2396_p0 }
  0x74   : > { %p2402_p7 = pnand %p2400_p5, %p2397_p2 }
  0x76   : > { %2405 = shalt.err (!%p2402_p7)
}
  0x77   : > { %s2406_s24 = scalar_lea.vmem %s445_s27, 16  ;;  %s2413_s19 = scalar_lea.vmem %s445_s27, 32 }
  0x78   : > { %p2407_p9 = scmp.ne.s32.totalorder %s445_s27, %s2406_s24  ;;  %p2414_p12 = scmp.lt.s32.totalorder %s445_s27, %s445_s27 }
  0x79   : > { %p2415_p4 = scmp.lt.s32.totalorder %s2413_s19, %s2406_s24 }
  0x7a   : > { %p2409_p10 = pnand %p2407_p9, %p2970_p8 }
  0x7b   : > { %p2416_p1 = por %p2415_p4, %p2414_p12 }
  0x7c   : > { %p2410_p11 = pneg %p2409_p10 }
  0x7e   : > { %p2417_p3 = pnand %p2416_p1, %p2410_p11 }
  0x80   : > { %2420 = shalt.err (!%p2417_p3)
}
  0x81   : > { %2143 = dma.hbm_to_vmem [thread:$0]  (!%p2954_p6), %s3560_s7, 16, %s445_s27, [#allocation16]  }
  0x82   : > { %s2421_s20 = scalar_lea.hbm %s3562_s9, 16 }
  0x83   : > { %p2422_p13 = scmp.ne.s32.totalorder %s3562_s9, %s2421_s20  ;;  %p2428_p3 = scmp.lt.u32.totalorder %s2421_s20, %s3562_s9 }
  0x85   : > { %p2424_p0 = pnand %p2422_p13, %p2970_p8 }
  0x87   : > { %p2425_p1 = pneg %p2424_p0 }
  0x89   : > { %p2430_p2 = pnand %p2428_p3, %p2425_p1 }
  0x8b   : > { %2433 = shalt.err (!%p2430_p2)
}
  0x8c   : > { %s2434_s24 = scalar_lea.vmem %s469_s17, 16  ;;  %s2441_s27 = scalar_lea.vmem %s469_s17, 32 }
  0x8d   : > { %p2435_p5 = scmp.ne.s32.totalorder %s469_s17, %s2434_s24  ;;  %p2442_p10 = scmp.lt.s32.totalorder %s469_s17, %s469_s17 }
  0x8e   : > { %p2443_p11 = scmp.lt.s32.totalorder %s2441_s27, %s2434_s24 }
  0x8f   : > { %p2437_p7 = pnand %p2435_p5, %p2970_p8 }
  0x90   : > { %p2444_p12 = por %p2443_p11, %p2442_p10 }
  0x91   : > { %p2438_p9 = pneg %p2437_p7 }
  0x93   : > { %p2445_p4 = pnand %p2444_p12, %p2438_p9 }
  0x95   : > { %2448 = shalt.err (!%p2445_p4)
}
  0x96   : > { %2149 = dma.hbm_to_vmem [thread:$0]  (!%p2954_p6), %s3562_s9, 16, %s469_s17, [#allocation19]  }
  0x97   : > { %s2810_s14 = smov [#allocation21]   ;;  %s2811_s26 = smov [#allocation11]  }
  0x98   : > { %s492_s21 = sshll.u32 %s2810_s14, 4  ;;  %s409_s20 = sshll.u32 %s2811_s26, 4  ;;  %s493_s21 = int_to_ptr.vmem [resolvable:$true] %s492_s21  ;;  %s410_s20 = int_to_ptr.vmem [resolvable:$true] %s409_s20 }
  0x99   : > { %s2449_s22 = scalar_lea.hbm %s3564_s11, 16 }
  0x9a   : > { %p2450_p13 = scmp.ne.s32.totalorder %s3564_s11, %s2449_s22  ;;  %p2456_p3 = scmp.lt.u32.totalorder %s2449_s22, %s3564_s11 }
  0x9c   : > { %p2452_p0 = pnand %p2450_p13, %p2970_p8 }
  0x9e   : > { %p2453_p1 = pneg %p2452_p0 }
  0xa0   : > { %p2458_p2 = pnand %p2456_p3, %p2453_p1 }
  0xa2   : > { %2461 = shalt.err (!%p2458_p2)
}
  0xa3   : > { %s2462_s17 = scalar_lea.vmem %s493_s21, 16  ;;  %s2469_s1 = scalar_lea.vmem %s493_s21, 32 }
  0xa4   : > { %p2463_p5 = scmp.ne.s32.totalorder %s493_s21, %s2462_s17  ;;  %p2470_p10 = scmp.lt.s32.totalorder %s493_s21, %s493_s21 }
  0xa5   : > { %p2471_p11 = scmp.lt.s32.totalorder %s2469_s1, %s2462_s17 }
  0xa6   : > { %p2465_p7 = pnand %p2463_p5, %p2970_p8 }
  0xa7   : > { %p2472_p12 = por %p2471_p11, %p2470_p10 }
  0xa8   : > { %p2466_p9 = pneg %p2465_p7 }
  0xaa   : > { %p2473_p4 = pnand %p2472_p12, %p2466_p9 }
  0xac   : > { %2476 = shalt.err (!%p2473_p4)
}
  0xad   : > { %2155 = dma.hbm_to_vmem [thread:$0]  (!%p2954_p6), %s3564_s11, 16, %s493_s21, [#allocation22]  }
  0xae   : > { %s3596_s4 = sld [smem:[#allocation43_spill]] }
  0xb4   : > { %s2477_s22 = scalar_lea.hbm %s3596_s4, 16 }
  0xb5   : > { %p2478_p13 = scmp.ne.s32.totalorder %s3596_s4, %s2477_s22  ;;  %p2484_p3 = scmp.lt.u32.totalorder %s2477_s22, %s3596_s4 }
  0xb7   : > { %p2480_p0 = pnand %p2478_p13, %p2970_p8 }
  0xb9   : > { %p2481_p1 = pneg %p2480_p0 }
  0xbb   : > { %p2486_p2 = pnand %p2484_p3, %p2481_p1 }
  0xbd   : > { %2489 = shalt.err (!%p2486_p2)
}
  0xbe   : > { %s2490_s17 = scalar_lea.vmem %s410_s20, 16  ;;  %s2497_s21 = scalar_lea.vmem %s410_s20, 32 }
  0xbf   : > { %p2491_p5 = scmp.ne.s32.totalorder %s410_s20, %s2490_s17  ;;  %p2498_p10 = scmp.lt.s32.totalorder %s410_s20, %s410_s20 }
  0xc0   : > { %p2499_p11 = scmp.lt.s32.totalorder %s2497_s21, %s2490_s17 }
  0xc1   : > { %p2493_p7 = pnand %p2491_p5, %p2970_p8 }
  0xc2   : > { %p2500_p12 = por %p2499_p11, %p2498_p10 }
  0xc3   : > { %p2494_p9 = pneg %p2493_p7 }
  0xc5   : > { %p2501_p4 = pnand %p2500_p12, %p2494_p9 }
  0xc7   : > { %2504 = shalt.err (!%p2501_p4)
}
  0xc8   : > { %2134 = dma.hbm_to_vmem [thread:$0]  (!%p2954_p6), %s3596_s4, 16, %s410_s20, [#allocation10]  }
  0xc9   : > { %s2812_s26 = smov [#allocation14]   ;;  %s3597_s6 = sld [smem:[#allocation45_spill]] }
  0xca   : > { %s430_s28 = sshll.u32 %s2812_s26, 4  ;;  %s431_s28 = int_to_ptr.vmem [resolvable:$true] %s430_s28 }
  0xcf   : > { %s2505_s0 = scalar_lea.hbm %s3597_s6, 256 }
  0xd0   : > { %p2506_p13 = scmp.ne.s32.totalorder %s3597_s6, %s2505_s0  ;;  %p2512_p3 = scmp.lt.u32.totalorder %s2505_s0, %s3597_s6 }
  0xd2   : > { %p2508_p0 = pnand %p2506_p13, %p2970_p8 }
  0xd4   : > { %p2509_p1 = pneg %p2508_p0 }
  0xd6   : > { %p2514_p2 = pnand %p2512_p3, %p2509_p1 }
  0xd8   : > { %2517 = shalt.err (!%p2514_p2)
}
  0xd9   : > { %s2518_s20 = scalar_lea.vmem %s431_s28, 256  ;;  %p2526_p10 = scmp.lt.s32.totalorder %s431_s28, %s431_s28 }
  0xda   : > { %p2519_p5 = scmp.ne.s32.totalorder %s431_s28, %s2518_s20  ;;  %p2527_p11 = scmp.lt.s32.totalorder %s2518_s20, %s2518_s20 }
  0xdc   : > { %p2521_p7 = pnand %p2519_p5, %p2970_p8  ;;  %p2528_p12 = por %p2527_p11, %p2526_p10 }
  0xde   : > { %p2522_p9 = pneg %p2521_p7 }
  0xe0   : > { %p2529_p4 = pnand %p2528_p12, %p2522_p9 }
  0xe2   : > { %2532 = shalt.err (!%p2529_p4)
}
  0xe3   : > { %s2813_s21 = smov 64   ;;  %s2814_s1 = smov 4  }
  0xe4   : > { %2140 = dma.hbm_to_vmem [thread:$0]  (!%p2954_p6), %s3597_s6, 256, %s431_s28, [#allocation13], %s2813_s21, %s2813_s21, %s2814_s1  }
  0xe5   : > { %s2815_s18 = smov [#allocation17]   ;;  %s2816_s0 = smov [#allocation20]  }
  0xe6   : > { %s454_s22 = sshll.u32 %s2815_s18, 4  ;;  %s478_s24 = sshll.u32 %s2816_s0, 4  ;;  %s455_s22 = int_to_ptr.vmem [resolvable:$true] %s454_s22  ;;  %s3134_s24 = int_to_ptr.vmem [resolvable:$true] %s478_s24 }
  0xe7   : > { %s2533_s17 = scalar_lea.hbm %s3561_s8, 256 }
  0xe8   : > { %p2534_p13 = scmp.ne.s32.totalorder %s3561_s8, %s2533_s17  ;;  %p2540_p3 = scmp.lt.u32.totalorder %s2533_s17, %s3561_s8 }
  0xea   : > { %p2536_p0 = pnand %p2534_p13, %p2970_p8 }
  0xec   : > { %p2537_p1 = pneg %p2536_p0 }
  0xee   : > { %p2542_p2 = pnand %p2540_p3, %p2537_p1 }
  0xf0   : > { %2545 = shalt.err (!%p2542_p2)
}
  0xf1   : > { %s2546_s26 = scalar_lea.vmem %s455_s22, 256  ;;  %p2554_p10 = scmp.lt.s32.totalorder %s455_s22, %s455_s22 }
  0xf2   : > { %p2547_p5 = scmp.ne.s32.totalorder %s455_s22, %s2546_s26  ;;  %p2555_p11 = scmp.lt.s32.totalorder %s2546_s26, %s2546_s26 }
  0xf4   : > { %p2549_p7 = pnand %p2547_p5, %p2970_p8  ;;  %p2556_p12 = por %p2555_p11, %p2554_p10 }
  0xf6   : > { %p2550_p9 = pneg %p2549_p7 }
  0xf8   : > { %p2557_p4 = pnand %p2556_p12, %p2550_p9 }
  0xfa   : > { %2560 = shalt.err (!%p2557_p4)
}
  0xfb   : > { %2146 = dma.hbm_to_vmem [thread:$0]  (!%p2954_p6), %s3561_s8, 256, %s455_s22, [#allocation16], %s2813_s21, %s2813_s21, %s2814_s1  }
  0xfc   : > { %s2561_s19 = scalar_lea.hbm %s3563_s10, 768 }
  0xfd   : > { %p2562_p13 = scmp.ne.s32.totalorder %s3563_s10, %s2561_s19  ;;  %p2568_p3 = scmp.lt.u32.totalorder %s2561_s19, %s3563_s10 }
  0xff   : > { %p2564_p0 = pnand %p2562_p13, %p2970_p8 }
 0x101   : > { %p2565_p1 = pneg %p2564_p0 }
 0x103   : > { %p2570_p2 = pnand %p2568_p3, %p2565_p1 }
 0x105   : > { %2573 = shalt.err (!%p2570_p2)
}
 0x106   : > { %s2574_s22 = scalar_lea.vmem %s3134_s24, 768  ;;  %p2582_p10 = scmp.lt.s32.totalorder %s3134_s24, %s3134_s24 }
 0x107   : > { %p2575_p5 = scmp.ne.s32.totalorder %s3134_s24, %s2574_s22  ;;  %p2583_p11 = scmp.lt.s32.totalorder %s2574_s22, %s2574_s22 }
 0x109   : > { %p2577_p7 = pnand %p2575_p5, %p2970_p8  ;;  %p2584_p12 = por %p2583_p11, %p2582_p10 }
 0x10b   : > { %p2578_p9 = pneg %p2577_p7 }
 0x10d   : > { %p2585_p4 = pnand %p2584_p12, %p2578_p9 }
 0x10f   : > { %2588 = shalt.err (!%p2585_p4)
}
 0x110   : > { %2152 = dma.hbm_to_vmem [thread:$0]  (!%p2954_p6), %s3563_s10, 768, %s3134_s24, [#allocation19], %s2813_s21, %s2813_s21, %s2814_s1  }
 0x111   : > { %s2817_s18 = smov [#allocation23]   ;;  %s2818_s27 = smov [#allocation24]  }
 0x112   : > { %s502_s0 = sshll.u32 %s2817_s18, 4  ;;  %s516_s19 = sshll.u32 %s2818_s27, 4  ;;  %s503_s0 = int_to_ptr.vmem [resolvable:$true] %s502_s0  ;;  %s3183_s19 = int_to_ptr.vmem [resolvable:$true] %s516_s19 }
 0x113   : > { %s2589_s14 = scalar_lea.hbm %s3565_s12, 1536 }
 0x114   : > { %p2590_p13 = scmp.ne.s32.totalorder %s3565_s12, %s2589_s14  ;;  %p2596_p3 = scmp.lt.u32.totalorder %s2589_s14, %s3565_s12 }
 0x116   : > { %p2592_p0 = pnand %p2590_p13, %p2970_p8 }
 0x118   : > { %p2593_p1 = pneg %p2592_p0 }
 0x11a   : > { %p2598_p2 = pnand %p2596_p3, %p2593_p1 }
 0x11c   : > { %2601 = shalt.err (!%p2598_p2)
}
 0x11d   : > { %s2602_s2 = scalar_lea.vmem %s503_s0, 1536  ;;  %p2610_p10 = scmp.lt.s32.totalorder %s503_s0, %s503_s0 }
 0x11e   : > { %p2603_p5 = scmp.ne.s32.totalorder %s503_s0, %s2602_s2  ;;  %p2611_p11 = scmp.lt.s32.totalorder %s2602_s2, %s2602_s2 }
 0x120   : > { %p2605_p7 = pnand %p2603_p5, %p2970_p8  ;;  %p2612_p12 = por %p2611_p11, %p2610_p10 }
 0x122   : > { %p2606_p9 = pneg %p2605_p7 }
 0x124   : > { %p2613_p4 = pnand %p2612_p12, %p2606_p9 }
 0x126   : > { %2616 = shalt.err (!%p2613_p4)
}
 0x127   : > { %2158 = dma.hbm_to_vmem [thread:$0]  (!%p2954_p6), %s3565_s12, 1536, %s503_s0, [#allocation22], %s2813_s21, %s2813_s21, %s2814_s1  }
 0x128   : > { %s2617_s14 = scalar_lea.hbm %s3566_s13, 16 }
 0x129   : > { %p2618_p13 = scmp.ne.s32.totalorder %s3566_s13, %s2617_s14  ;;  %p2624_p3 = scmp.lt.u32.totalorder %s2617_s14, %s3566_s13 }
 0x12b   : > { %p2620_p0 = pnand %p2618_p13, %p2970_p8 }
 0x12d   : > { %p2621_p1 = pneg %p2620_p0 }
 0x12f   : > { %p2626_p2 = pnand %p2624_p3, %p2621_p1 }
 0x131   : > { %2629 = shalt.err (!%p2626_p2)
}
 0x132   : > { %s2630_s21 = scalar_lea.vmem %s3183_s19, 16  ;;  %s2637_s1 = scalar_lea.vmem %s3183_s19, 32 }
 0x133   : > { %p2631_p5 = scmp.ne.s32.totalorder %s3183_s19, %s2630_s21  ;;  %p2638_p10 = scmp.lt.s32.totalorder %s3183_s19, %s3183_s19 }
 0x134   : > { %p2639_p11 = scmp.lt.s32.totalorder %s2637_s1, %s2630_s21 }
 0x135   : > { %p2633_p7 = pnand %p2631_p5, %p2970_p8 }
 0x136   : > { %p2640_p12 = por %p2639_p11, %p2638_p10 }
 0x137   : > { %p2634_p9 = pneg %p2633_p7 }
 0x139   : > { %p2641_p4 = pnand %p2640_p12, %p2634_p9 }
 0x13b   : > { %2644 = shalt.err (!%p2641_p4)
}
 0x13c   : > { %s3598_s23 = sld [smem:[#allocation37_spill]]  ;;  %s1883_s25 = sadd.s32 4294967294, %s2803_s16  }
 0x13d   : > { %2161 = dma.hbm_to_vmem [thread:$0]  (!%p2954_p6), %s3566_s13, 16, %s3183_s19, [#allocation25]  }
 0x13e   : > { %s3232_s18 = sadd.s32 1, %s2803_s16   ;;  %s46_s17 = sadd.s32 1, %s2799_s15 }
 0x13f   : > { %s43_s27 = ssub.s32 %s2803_s16, %s3232_s18  ;;  %p53_p13 = scmp.ne.s32.totalorder %s2799_s15, %s2795_s30 }
 0x140   : > { %p44_p8 = scmp.eq.s32.totalorder %s43_s27, 0  ;;  %p54_p0 = scmp.eq.s32.totalorder %s2803_s16, 0 }
 0x141   : > { %p59_p1 = scmp.ne.s32.totalorder %s2795_s30, %s2791_s29  ;;  %p367_p7 = scmp.eq.s32.totalorder %s1883_s25, 1 }
 0x142   : > { %s3243_s20 = scalar_select %p44_p8, %s2799_s15, %s46_s17  }
 0x143   : > { %p3245_p3 = por %p54_p0, %p53_p13  ;;  %p3600_p2 = scmp.eq.s32.totalorder %s3598_s23, 0 }
 0x144   : > { %p361_p5 = scmp.eq.s32.totalorder %s3598_s23, 1  ;;  %p2185_p9 = scmp.lt.s32.totalorder %s2803_s16, 2 }
 0x145   : > { %p3251_p6 = por %p3600_p2, %p59_p1  ;;  %s3258_s28 = sand.u32 1, %s2799_s15  }
 0x146   : > { %p3260_p10 = por %p361_p5, %p53_p13  ;;  %p3264_p11 = por %p367_p7, %p59_p1 }
 0x147   : > { %s3601_s19 = scalar_select %p3251_p6, 1, 0 }
 0x148   : > { %s3602_s22 = scalar_select %p3260_p10, 1, 0 }
 0x149   : > { %s3603_s26 = scalar_select %p3264_p11, 1, 0 }
 0x14a   : > { %s1898_s24 = sshll.u32 %s3258_s28, 3  ;;  %s1899_s21 = sshll.u32 %s2803_s16, 7 }
 0x14b   : > { %s3604_s2 = sld [smem:[#allocation39_spill]]  ;;  %s531_s25 = scalar_lea.vmem [#allocation3], %s1898_s24 }
 0x14c   : > { %s538_s27 = sshll.u32 %s531_s25, 4  ;;  %p3279_p12 = pnand %p2185_p9, %p3245_p3  ;;  %s3275_s27 = int_to_ptr.vmem [resolvable:$true] %s538_s27 }
 0x14d   : > { %s528_s4 = scalar_lea.sflag [#allocation4], %s3258_s28 }
 0x14e   : > { %p2647_p8 = pneg %p3279_p12 }
 0x151   : > { %s3273_s23 = scalar_lea.hbm %s3604_s2, %s1899_s21  ;;  %s2650_s14 = scalar_lea.hbm %s3604_s2, 256 }
 0x152   : > { %s2645_s1 = scalar_lea.hbm %s3273_s23, 128  ;;  %p2651_p1 = scmp.lt.u32.totalorder %s3273_s23, %s3604_s2 }
 0x153   : > { %p2646_p4 = scmp.ne.s32.totalorder %s3273_s23, %s2645_s1  ;;  %p2652_p3 = scmp.lt.u32.totalorder %s2650_s14, %s2645_s1 }
 0x154   : > { %p2654_p5 = scmp.lt.u32.totalorder %s2645_s1, %s3273_s23 }
 0x155   : > { %p2648_p13 = pnand %p2647_p8, %p2646_p4  ;;  %p2653_p2 = por %p2652_p3, %p2651_p1 }
 0x157   : > { %p2649_p0 = pneg %p2648_p13  ;;  %p2655_p7 = por %p2654_p5, %p2653_p2 }
 0x159   : > { %p2656_p9 = pnand %p2655_p7, %p2649_p0 }
 0x15b   : > { %2659 = shalt.err (!%p2656_p9)
}
 0x15c   : > { %s2660_s3 = scalar_lea.vmem %s3275_s27, 128  ;;  %s2819_s24 = smov [#allocation3]  }
 0x15d   : > { %p2661_p4 = scmp.ne.s32.totalorder %s3275_s27, %s2660_s3  ;;  %s2665_s21 = sshll.u32 %s2819_s24, 4  ;;  %s2666_s21 = int_to_ptr.vmem [resolvable:$false] %s2665_s21 }
 0x15e   : > { %s2667_s0 = scalar_lea.vmem %s2666_s21, 256  ;;  %p2668_p10 = scmp.lt.s32.totalorder %s3275_s27, %s2666_s21 }
 0x15f   : > { %p2663_p13 = pnand %p2661_p4, %p2647_p8  ;;  %p2669_p1 = scmp.lt.s32.totalorder %s2667_s0, %s2660_s3 }
 0x161   : > { %p2664_p11 = pneg %p2663_p13  ;;  %p2670_p3 = por %p2669_p1, %p2668_p10 }
 0x163   : > { %p2671_p2 = pnand %p2670_p3, %p2664_p11 }
 0x165   : > { %2674 = shalt.err (!%p2671_p2)
}
 0x166   : > { %2165 = dma.hbm_to_vmem [thread:$0]  (!%p3279_p12), %s3273_s23, 128, %s3275_s27, %s528_s4  }
 0x167   : > { %s1900_s1 = sshll.u32 %s2803_s16, 4  ;;  %s548_s14 = scalar_lea.vmem [#allocation6], %s3258_s28 }
 0x168   : > { %s555_s25 = sshll.u32 %s548_s14, 4  ;;  %s3606_s5 = sld [smem:[#allocation40_spill]]  ;;  %s556_s25 = int_to_ptr.vmem [resolvable:$true] %s555_s25 }
 0x169   : > { %s3607_s3 = sand.u32 1, %s2803_s16  }
 0x16a   : > { %s546_s0 = scalar_lea.sflag [#allocation7], %s3607_s3 }
 0x16e   : > { %s3315_s21 = scalar_lea.hbm %s3606_s5, %s1900_s1  ;;  %s2680_s23 = scalar_lea.hbm %s3606_s5, 32 }
 0x16f   : > { %s2675_s6 = scalar_lea.hbm %s3315_s21, 16  ;;  %p2681_p5 = scmp.lt.u32.totalorder %s3315_s21, %s3606_s5 }
 0x170   : > { %p2676_p10 = scmp.ne.s32.totalorder %s3315_s21, %s2675_s6  ;;  %p2682_p7 = scmp.lt.u32.totalorder %s2680_s23, %s2675_s6 }
 0x171   : > { %p2684_p4 = scmp.lt.u32.totalorder %s2675_s6, %s3315_s21 }
 0x172   : > { %p2678_p11 = pnand %p2676_p10, %p2647_p8  ;;  %p2683_p9 = por %p2682_p7, %p2681_p5 }
 0x174   : > { %p2679_p0 = pneg %p2678_p11  ;;  %p2685_p13 = por %p2684_p4, %p2683_p9 }
 0x176   : > { %p2686_p1 = pnand %p2685_p13, %p2679_p0 }
 0x178   : > { %2689 = shalt.err (!%p2686_p1)
}
 0x179   : > { %s2690_s1 = scalar_lea.vmem %s556_s25, 16  ;;  %s2820_s14 = smov [#allocation6]  }
 0x17a   : > { %p2691_p3 = scmp.ne.s32.totalorder %s556_s25, %s2690_s1  ;;  %s2695_s24 = sshll.u32 %s2820_s14, 4  ;;  %s2696_s24 = int_to_ptr.vmem [resolvable:$false] %s2695_s24 }
 0x17b   : > { %s2697_s3 = scalar_lea.vmem %s2696_s24, 32  ;;  %p2698_p11 = scmp.lt.s32.totalorder %s556_s25, %s2696_s24 }
 0x17c   : > { %p2693_p2 = pnand %p2691_p3, %p2647_p8  ;;  %p2699_p6 = scmp.lt.s32.totalorder %s2697_s3, %s2690_s1 }
 0x17e   : > { %p2694_p10 = pneg %p2693_p2  ;;  %p2700_p5 = por %p2699_p6, %p2698_p11 }
 0x180   : > { %p2701_p7 = pnand %p2700_p5, %p2694_p10 }
 0x182   : > { %2704 = shalt.err (!%p2701_p7)
}
 0x183   : > { %2168 = dma.hbm_to_vmem [thread:$0]  (!%p3279_p12), %s3315_s21, 16, %s556_s25, %s546_s0  }
 0x184   : > { %s3608_s6 = sld [smem:[#allocation38_spill]] }
 0x18a   : > { %p3609_p0 = scmp.ne.s32.totalorder %s3608_s6, 0 }
 0x18b   : > { %s3341_s4 = sand.u32 (!%p3609_p0), 1, %s2795_s30   ;;  %p3610_p6 = scmp.ne.s32.totalorder (!%p3609_p0), %s3601_s19, 0 }
 0x18c   : > { %564 = sbr.rel (%p3609_p0) target bundleno = 3264 (0xcc0), region = 76  ;;  %s1902_s28 = sshll.u32 (!%p3609_p0), %s3341_s4, 3 }
 0x18d   : > { %s567_s23 = scalar_lea.sflag (!%p3609_p0), [#allocation4], %s3341_s4  ;;  %s570_s2 = scalar_lea.vmem (!%p3609_p0), [#allocation3], %s1902_s28 }
 0x193   : > { %2750 = dma.done.wait (%p3610_p6), %s567_s23, 128  }
 0x194   : > { %2752 = vsyncadd (%p3610_p6), %s567_s23, 4294967168  ;;  %s3611_s17 = sld [smem:[#allocation37_spill]]  ;;  %s578_s0 = scalar_lea.vmem [#allocation6], %s3341_s4 }
 0x19a   : > { %s575_s25 = sand.u32 1, %s3611_s17  }
 0x19b   : > { %s576_s21 = scalar_lea.sflag [#allocation7], %s575_s25 }
 0x19c   : > { %2754 = dma.done.wait (%p3610_p6), %s576_s21, 16  }
 0x19d   : > { %2756 = vsyncadd (%p3610_p6), %s576_s21, 4294967280  ;;  %p3612_p12 = scmp.eq.s32.totalorder %s3611_s17, 0 }
 0x19f   : > { %2758 = dma.done.wait (%p3612_p12), [#allocation7], 16   ;;  %p3613_p8 = pmov %p3612_p12 }
 0x1a1   : > { %2760 = vsyncadd (%p3613_p8), [#allocation7], 4294967280  ;;  %p3614_p9 = pmov %p3613_p8 }
 0x1a2   : > { %p3615_p4 = pmov %p3613_p8 }
 0x1a3   : > { %2762 = dma.done.wait (%p3614_p9), [#allocation10], 32  }
 0x1a4   : > { %2764 = vsyncadd (%p3615_p4), [#allocation10], 4294967264  ;;  %p3616_p13 = pmov %p3615_p4 }
 0x1a5   : > { %p3617_p1 = pmov %p3615_p4 }
 0x1a6   : > { %2766 = dma.done.wait (%p3616_p13), [#allocation13], 272  }
 0x1a7   : > { %2768 = vsyncadd (%p3617_p1), [#allocation13], 4294967024  ;;  %p3618_p3 = pmov %p3617_p1 }
 0x1a8   : > { %p3619_p2 = pmov %p3617_p1 }
 0x1a9   : > { %2770 = dma.done.wait (%p3618_p3), [#allocation16], 272  }
 0x1aa   : > { %2772 = vsyncadd (%p3619_p2), [#allocation16], 4294967024  ;;  %p3620_p10 = pmov %p3617_p1 }
 0x1ab   : > { %p3621_p11 = pmov %p3617_p1 }
 0x1ac   : > { %2774 = dma.done.wait (%p3620_p10), [#allocation19], 784  }
 0x1ad   : > { %2776 = vsyncadd (%p3621_p11), [#allocation19], 4294966512  ;;  %p3622_p5 = pmov %p3617_p1 }
 0x1ae   : > { %p3623_p7 = pmov %p3617_p1 }
 0x1af   : > { %2778 = dma.done.wait (%p3622_p5), [#allocation22], 1552  }
 0x1b0   : > { %2780 = vsyncadd (%p3623_p7), [#allocation22], 4294965744  ;;  %p3624_p0 = pmov %p3617_p1 }
 0x1b2   : > { %2782 = dma.done.wait (%p3624_p0), [#allocation25], 16   ;;  %p3625_p6 = pmov %p3624_p0 }
 0x1b3   : > { %vm682_vm0 = vcmask 261120   ;;  %v676_v0 = vld [vmem:[%s570_s2] sm:$0xff]  ;;  %v2821_v8 = vmov 0.0   ;;  %vm2822_vm1 = vmmov 0   ;;  %v1916_v18 = vld [vmem:[#allocation8] ss:$0 sm:$0xff]  ;;  %v838_v43 = vlaneseq }
 0x1b4   : > { %2784 = vsyncadd (%p3625_p6), [#allocation25], 4294967280  ;;  %v683_v1 = vsel %vm682_vm0, %v676_v0, 0.0  ;;  %v2263_v7 = vld [vmem:[#allocation14] sm:$0xff]   ;;  %1991 = vmatprep.subr.bf16.mxu0 %v2821_v8  ;;  %1995 = vmatprep.mubr.msk.bf16.mxu0 %vm2822_vm1, %v2821_v8  ;;  %v2264_v9 = vld [vmem:[#allocation14 + $0x8] sm:$0xff]   ;;  %s2823_s19 = smov 120  }
 0x1b5   : > { %684 = vadd.xlane.f32.xlu0 %v683_v1  ;;  %1992 = vmatpush3.bf16.msra.mxu0 %v2263_v7  ;;  %v1917_v21 = vld [vmem:[#allocation9] ss:$0 sm:$0xff]  ;;  %v1918_v25 = vld [vmem:[#allocation15] ss:$0 sm:$0xff]  ;;  %s2824_s27 = smov 96   ;;  %s2825_s1 = smov 88  }
 0x1b6   : > { %2011 = vmatprep.subr.bf16.mxu1 %v2821_v8  ;;  %1993 = vmatprep.subr.bf16.mxu0 %v2821_v8  ;;  %s2826_s14 = smov 80   ;;  %s2827_s24 = smov 112   ;;  %vm789_vm4 = vcmask 64512   ;;  %v677_v44 = vld [vmem:[%s578_s0] sm:$0x1]  ;;  %v839_v45 = vshrl.u32 %v838_v43, 7 }
 0x1b7   : > { %2013 = vmatprep.mubr.msk.bf16.mxu1 %vm2822_vm1, %v2821_v8  ;;  %s2828_s3 = smov 72   ;;  %s2829_s6 = smov 104   ;;  %vm678_vm5 = vcmp.eq.f32.partialorder %v677_v44, 0.0  ;;  %vm861_vm6 = vcmask 1043456   ;;  %vm1022_vm7 = vcmask 130112   ;;  %vm1140_vm8 = vcmask 195712  }
 0x1b8   : > { %v840_v46 = vsub.s32 0, %v839_v45  ;;  %v679_v47 = vsel %vm678_vm5, -1e+09, %v2821_v8  ;;  %s2830_s23 = smov 64   ;;  %s2831_s2 = smov 56   ;;  %vm1258_vm9 = vcmask 261312  }
 0x1b9   : > { %1994 = vmatpush3.bf16.msra.mxu0 %v2264_v9  ;;  %s2832_s25 = smov 48   ;;  %s2833_s21 = smov 40   ;;  %vm1382_vm12 = vsmask.f32 3328  ;;  %vm1374_vm14 = vcmask 1040384  }
 0x1ba   : > { %1999 = vmatprep.subr.bf16.mxu0 %v2821_v8  ;;  %v841_v48 = vrot.slane %v679_v47, %v840_v46  ;;  %s2834_s0 = smov 8   ;;  %vm3479_vm13 = vmand %vm861_vm6, %vm1382_vm12  ;;  %vm1375_vm15 = vsmask.f32 256  ;;  %p3631_p8 = scmp.ne.s32.totalorder %s3602_s22, 0 }
 0x242   : > { %v685_v2 = vpop.xlane.xlu0 %684 }
 0x243   : > { %v687_v3 = vmul.f32 0.03125, %v685_v2 }
 0x245   : > { %v688_v4 = vsub.f32 %v676_v0, %v687_v3 }
 0x247   : > { %v689_v5 = vmul.f32 %v688_v4, %v688_v4  ;;  %v709_v19 = vmul.f32 %v1916_v18, %v688_v4 }
 0x249   : > { %v690_v6 = vsel %vm682_vm0, %v689_v5, 0.0 }
 0x24a   : > { %691 = vadd.xlane.f32.xlu0 %v690_v6 }
 0x2d7   : > { %v692_v10 = vpop.xlane.xlu0 %691 }
 0x2d8   : > { %v693_v11 = vmul.f32 0.032258064, %v692_v10 }
 0x2da   : > { %2285 = vrsqrt.f32 %v693_v11  ;;  %vm696_vm2 = vcmp.eq.f32.partialorder %v693_v11, inf  ;;  %v699_v14 = vand.u32 2147483648, %v693_v11  ;;  %vm698_vm3 = vcmp.eq.f32.partialorder %v693_v11, 0.0 }
 0x2e4   : > { %v2286_v12 = vpop.eup %2285 }
 0x2e5   : > { %v695_v13 = vmul.f32 %v2286_v12, %v693_v11 }
 0x2e7   : > { %v697_v15 = vsel %vm696_vm2, %v693_v11, %v695_v13  ;;  %vm1394_vm2 = vcmask 523264  }
 0x2e8   : > { %v700_v16 = vsel %vm698_vm3, %v699_v14, %v697_v15  ;;  %vm1452_vm3 = vcmask 785408  }
 0x2e9   : > { %v701_v17 = vadd.f32 1e-06, %v700_v16 }
 0x2eb   : > { %2287 = vrcp.f32 %v701_v17 }
 0x2f5   : > { %v2288_v20 = vpop.eup %2287 }
 0x2f6   : > { %v710_v22 = vmul.f32 %v2288_v20, %v709_v19 }
 0x2f8   : > { %v717_v23 = vadd.f32 %v1917_v21, %v710_v22 }
 0x2fa   : > { %v718_v24 = vpack.c.bf16 %v717_v23, %v717_v23 }
 0x2fc   : > { %1996 = vmatmul.mubr.msk.bf16.vlgmr.msra.gmra.mrb[0].mxu0 %vm682_vm0, %v718_v24 }
 0x2fd   : > { %2001 = vmatprep.mubr.msk.bf16.mxu0 %vm2822_vm1, %v2821_v8 }
 0x3cf   : > { %v779_v26 = vpop.f32.mrb[0].mxu0 }
 0x3d0   : > { %v780_v27 = vadd.f32 %v1918_v25, %v779_v26  ;;  %v1997_v28 = vpop.f32.mrb[1].mxu0 }
 0x3d1   : > { %v782_v29 = vpop.f32.mrb[2].mxu0 }
 0x3d2   : > { %v3398_v30 = vpack.c.bf16 %v780_v27, %v780_v27  ;;  %v1998_v31 = vpop.f32.mrb[3].mxu0 }
 0x3d4   : > { %906 = vrot.lane.b32.xlu0 %v3398_v30, %s2823_s19  ;;  %787 = vrot.lane.b32.xlu1 %v3398_v30, %s2824_s27  ;;  %s2835_s19 = smov 16   ;;  %s2836_s27 = smov 24  }
 0x3d8   : > { %908 = vrot.lane.b32.xlu1 %v3398_v30, %s2825_s1  ;;  %s2837_s1 = smov 32  }
 0x3dc   : > { %1026 = vrot.lane.b32.xlu1 %v3398_v30, %s2826_s14  ;;  %s1959_s14 = sshll.u32 %s3611_s17, 7 }
 0x3e0   : > { %1024 = vrot.lane.b32.xlu1 %v3398_v30, %s2827_s24  ;;  %s674_s24 = scalar_lea.vmem [#allocation26], %s1902_s28  ;;  %s1666_s28 = scalar_lea.sflag [#allocation5], %s3341_s4 }
 0x3e4   : > { %1144 = vrot.lane.b32.xlu1 %v3398_v30, %s2828_s3  ;;  %s1679_s3 = sshll.u32 %s674_s24, 4  ;;  %s3510_s3 = int_to_ptr.vmem [resolvable:$true] %s1679_s3 }
 0x3e5   : > { %s2705_s17 = scalar_lea.vmem %s3510_s3, 128 }
 0x3e6   : > { %p2706_p12 = scmp.ne.s32.totalorder %s3510_s3, %s2705_s17 }
 0x3e8   : > { %1142 = vrot.lane.b32.xlu1 %v3398_v30, %s2829_s6  ;;  %p2707_p9 = pnand %p2706_p12, %p3631_p8 }
 0x3ea   : > { %p2708_p4 = pneg %p2707_p9 }
 0x446   : > { %v788_v32 = vpop.permute.xlu1 %787  ;;  %v907_v37 = vpop.permute.xlu0 %906 }
 0x447   : > { %v794_v33 = vsel %vm789_vm4, %v788_v32, 0 }
 0x448   : > { %2000 = vmatpush3.bf16.xpose.msra.mxu0 %v794_v33 }
 0x449   : > { %2005 = vmatprep.subr.bf16.mxu0 %v2821_v8 }
 0x44a   : > { %v909_v34 = vpop.permute.xlu1 %908 }
 0x44b   : > { %v914_v35 = vsel %vm789_vm4, %v909_v34, 0 }
 0x44c   : > { %2012 = vmatpush3.bf16.xpose.msra.mxu1 %v914_v35 }
 0x44d   : > { %2023 = vmatprep.subr.bf16.mxu1 %v2821_v8 }
 0x44e   : > { %v1027_v36 = vpop.permute.xlu1 %1026 }
 0x44f   : > { %2002 = vmatmul.mubr.msk.bf16.vlgmr.msra.gmra.mrb[4].mxu0 %vm789_vm4, %v3398_v30  ;;  %v1032_v39 = vsel %vm789_vm4, %v1027_v36, 0 }
 0x450   : > { %2007 = vmatprep.mubr.msk.bf16.mxu0 %vm2822_vm1, %v2821_v8 }
 0x452   : > { %v1025_v38 = vpop.permute.xlu1 %1024 }
 0x453   : > { %2014 = vmatmul.mubr.msk.bf16.vlgmr.msra.gmra.mrb[0].mxu1 %vm789_vm4, %v907_v37 }
 0x454   : > { %2024 = vmatpush3.bf16.xpose.msra.mxu1 %v1032_v39  ;;  %2025 = vmatprep.mubr.msk.bf16.mxu1 %vm2822_vm1, %v2821_v8 }
 0x455   : > { %2035 = vmatprep.subr.bf16.mxu1 %v2821_v8 }
 0x456   : > { %v1145_v40 = vpop.permute.xlu1 %1144 }
 0x457   : > { %v1150_v41 = vsel %vm789_vm4, %v1145_v40, 0 }
 0x45a   : > { %v1143_v42 = vpop.permute.xlu1 %1142 }
 0x45b   : > { %2026 = vmatmul.mubr.msk.bf16.vlgmr.msra.gmra.mrb[4].mxu1 %vm789_vm4, %v1025_v38 }
 0x45c   : > { %2036 = vmatpush3.bf16.xpose.msra.mxu1 %v1150_v41  ;;  %2037 = vmatprep.mubr.msk.bf16.mxu1 %vm2822_vm1, %v2821_v8 }
 0x45d   : > { %2047 = vmatprep.subr.bf16.mxu1 %v2821_v8 }
 0x463   : > { %2038 = vmatmul.mubr.msk.bf16.vlgmr.msra.gmra.mrb[8].mxu1 %vm789_vm4, %v1143_v42 }
 0x464   : > { %2051 = vmatprep.mubr.msk.bf16.mxu1 %vm2822_vm1, %v2821_v8 }
 0x522   : > { %v830_v49 = vpop.f32.mrb[4].mxu0 }
 0x523   : > { %v836_v50 = vmul.f32 0.35355338, %v830_v49  ;;  %v2003_v51 = vpop.f32.mrb[5].mxu0 }
 0x524   : > { %v833_v52 = vpop.f32.mrb[6].mxu0 }
 0x525   : > { %v2004_v53 = vpop.f32.mrb[7].mxu0  ;;  %v843_v54 = vadd.f32 %v841_v48, %v836_v50 }
 0x526   : > { %v950_v55 = vpop.f32.mrb[0].mxu1 }
 0x527   : > { %v956_v56 = vmul.f32 0.35355338, %v950_v55  ;;  %v2015_v57 = vpop.f32.mrb[1].mxu1  ;;  %v844_v58 = vsel %vm789_vm4, %v843_v54, -inf }
 0x528   : > { %v953_v59 = vpop.f32.mrb[2].mxu1  ;;  %845 = vmax.xlane.f32.xlu1 %v844_v58 }
 0x529   : > { %v2016_v60 = vpop.f32.mrb[3].mxu1  ;;  %v957_v61 = vadd.f32 %v956_v56, %v841_v48 }
 0x52b   : > { %v958_v62 = vsel %vm789_vm4, %v957_v61, -inf }
 0x52c   : > { %959 = vmax.xlane.f32.xlu0 %v958_v62 }
 0x52e   : > { %v1068_v63 = vpop.f32.mrb[4].mxu1 }
 0x52f   : > { %v1074_v0 = vmul.f32 0.35355338, %v1068_v63  ;;  %v2027_v1 = vpop.f32.mrb[5].mxu1 }
 0x530   : > { %v1071_v2 = vpop.f32.mrb[6].mxu1 }
 0x531   : > { %v2028_v3 = vpop.f32.mrb[7].mxu1  ;;  %v1075_v4 = vadd.f32 %v1074_v0, %v841_v48  ;;  %v2265_v2 = vld [vmem:[#allocation17] sm:$0xff]  }
 0x532   : > { %2048 = vmatpush3.bf16.msra.mxu1 %v2265_v2  ;;  %v2266_v3 = vld [vmem:[#allocation17 + $0x8] sm:$0xff]   ;;  %v2838_v2 = vmov 0  }
 0x533   : > { %v1076_v5 = vsel %vm789_vm4, %v1075_v4, -inf  ;;  %2049 = vmatprep.subr.bf16.mxu1 %v2821_v8 }
 0x534   : > { %1077 = vmax.xlane.f32.xlu1 %v1076_v5 }
 0x536   : > { %v1186_v6 = vpop.f32.mrb[8].mxu1  ;;  %2050 = vmatpush3.bf16.msra.mxu1 %v2266_v3  ;;  %v2274_v3 = vld [vmem:[#allocation23 + $0x8] sm:$0xff]  }
 0x537   : > { %v1192_v7 = vmul.f32 0.35355338, %v1186_v6  ;;  %v2039_v9 = vpop.f32.mrb[9].mxu1  ;;  %1623 = vmatprep.subr.bf16.mxu1 %v2838_v2 }
 0x538   : > { %v1189_v10 = vpop.f32.mrb[10].mxu1 }
 0x539   : > { %v2040_v11 = vpop.f32.mrb[11].mxu1  ;;  %v1193_v12 = vadd.f32 %v1192_v7, %v841_v48 }
 0x53b   : > { %v1194_v13 = vsel %vm789_vm4, %v1193_v12, -inf }
 0x53c   : > { %1195 = vmax.xlane.f32.xlu0 %v1194_v13 }
 0x5b5   : > { %v846_v14 = vpop.xlane.xlu1 %845 }
 0x5b6   : > { %v847_v15 = vsub.f32 %v843_v54, %v846_v14 }
 0x5b8   : > { %v848_v16 = vmul.f32 1.442695, %v847_v15 }
 0x5b9   : > { %v960_v17 = vpop.xlane.xlu0 %959 }
 0x5ba   : > { %2289 = vpow2.f32 %v848_v16  ;;  %v961_v18 = vsub.f32 %v957_v61, %v960_v17 }
 0x5bc   : > { %v962_v19 = vmul.f32 1.442695, %v961_v18  ;;  %v1930_v18 = vld [vmem:[#allocation18] ss:$0 sm:$0xff] }
 0x5be   : > { %2291 = vpow2.f32 %v962_v19 }
 0x5c1   : > { %v1078_v29 = vpop.xlane.xlu1 %1077 }
 0x5c2   : > { %v1079_v31 = vsub.f32 %v1075_v4, %v1078_v29 }
 0x5c4   : > { %v2290_v20 = vpop.eup %2289  ;;  %v1080_v32 = vmul.f32 1.442695, %v1079_v31 }
 0x5c5   : > { %v850_v21 = vsel %vm789_vm4, %v2290_v20, 0.0 }
 0x5c6   : > { %851 = vadd.xlane.f32.xlu1 %v850_v21 }
 0x5c8   : > { %v2292_v22 = vpop.eup %2291 }
 0x5c9   : > { %v1196_v23 = vpop.xlane.xlu0 %1195  ;;  %v964_v24 = vsel %vm789_vm4, %v2292_v22, 0.0 }
 0x5ca   : > { %v1197_v25 = vsub.f32 %v1193_v12, %v1196_v23  ;;  %965 = vadd.xlane.f32.xlu0 %v964_v24 }
 0x5cc   : > { %v1198_v26 = vmul.f32 1.442695, %v1197_v25 }
 0x5ce   : > { %2293 = vpow2.f32 %v1198_v26 }
 0x5cf   : > { %2295 = vpow2.f32 %v1080_v32  ;;  %v2267_v32 = vld [vmem:[#allocation20] sm:$0xff]  }
 0x5d7   : > { %856 = vrot.lane.b32.xlu1 %v3398_v30, %s2830_s23 }
 0x5d8   : > { %v2294_v27 = vpop.eup %2293 }
 0x5d9   : > { %v1200_v28 = vsel %vm789_vm4, %v2294_v27, 0.0  ;;  %v2296_v33 = vpop.eup %2295 }
 0x5da   : > { %1201 = vadd.xlane.f32.xlu0 %v1200_v28  ;;  %v1082_v34 = vsel %vm789_vm4, %v2296_v33, 0.0 }
 0x5f0   : > { %970 = vrot.lane.b32.xlu0 %v3398_v30, %s2831_s2  ;;  %s3630_s2 = sld [smem:[#allocation46_spill]] }
 0x5fb   : > { %1083 = vadd.xlane.f32.xlu1 %v1082_v34  ;;  %v2269_v34 = vld [vmem:[#allocation20 + $0x10] sm:$0xff]  }
 0x60c   : > { %1088 = vrot.lane.b32.xlu1 %v3398_v30, %s2832_s25  ;;  %s3508_s25 = scalar_lea.hbm %s3630_s2, %s1959_s14 }
 0x610   : > { %1206 = vrot.lane.b32.xlu1 %v3398_v30, %s2833_s21  ;;  %s2839_s21 = smov [#allocation26]  }
 0x653   : > { %v852_v35 = vpop.xlane.xlu1 %851 }
 0x654   : > { %2297 = vrcp.f32 %v852_v35  ;;  %v2270_v35 = vld [vmem:[#allocation20 + $0x18] sm:$0xff]  }
 0x657   : > { %v857_v36 = vpop.permute.xlu1 %856  ;;  %v966_v38 = vpop.xlane.xlu0 %965 }
 0x658   : > { %v863_v37 = vsel %vm861_vm6, %v857_v36, 0  ;;  %2299 = vrcp.f32 %v966_v38 }
 0x659   : > { %2006 = vmatpush3.bf16.msra.mxu0 %v863_v37 }
 0x65a   : > { %2017 = vmatprep.subr.bf16.mxu0 %v2821_v8 }
 0x65e   : > { %v2298_v39 = vpop.eup %2297 }
 0x65f   : > { %v854_v40 = vmul.f32 %v2298_v39, %v2290_v20 }
 0x661   : > { %v855_v41 = vpack.c.bf16 %v854_v40, %v854_v40 }
 0x662   : > { %v2300_v30 = vpop.eup %2299 }
 0x663   : > { %2008 = vmatmul.mubr.msk.bf16.vlgmr.msra.gmra.mrb[8].mxu0 %vm789_vm4, %v855_v41  ;;  %v968_v43 = vmul.f32 %v2300_v30, %v2292_v22 }
 0x664   : > { %2019 = vmatprep.mubr.msk.bf16.mxu0 %vm2822_vm1, %v2821_v8 }
 0x665   : > { %v969_v46 = vpack.c.bf16 %v968_v43, %v968_v43  ;;  %v2271_v43 = vld [vmem:[#allocation20 + $0x20] sm:$0xff]  }
 0x667   : > { %v1202_v42 = vpop.xlane.xlu0 %1201 }
 0x66b   : > { %v971_v44 = vpop.permute.xlu0 %970 }
 0x66c   : > { %v976_v45 = vsel %vm861_vm6, %v971_v44, 0  ;;  %v1934_v44 = vld [vmem:[#allocation11] ss:$0 sm:$0xff] }
 0x66d   : > { %2018 = vmatpush3.bf16.msra.mxu0 %v976_v45  ;;  %v2272_v45 = vld [vmem:[#allocation20 + $0x28] sm:$0xff]  }
 0x66e   : > { %2029 = vmatprep.subr.bf16.mxu0 %v2821_v8 }
 0x670   : > { %2020 = vmatmul.mubr.msk.bf16.vlgmr.msra.gmra.mrb[12].mxu0 %vm789_vm4, %v969_v46 }
 0x671   : > { %2031 = vmatprep.mubr.msk.bf16.mxu0 %vm2822_vm1, %v2821_v8 }
 0x688   : > { %v1084_v47 = vpop.xlane.xlu1 %1083 }
 0x689   : > { %2301 = vrcp.f32 %v1084_v47 }
 0x68a   : > { %2303 = vrcp.f32 %v1202_v42 }
 0x68c   : > { %v1089_v48 = vpop.permute.xlu1 %1088 }
 0x68d   : > { %v1094_v49 = vsel %vm861_vm6, %v1089_v48, 0  ;;  %v1935_v48 = vld [vmem:[#allocation12] ss:$0 sm:$0xff] }
 0x68e   : > { %2030 = vmatpush3.bf16.msra.mxu0 %v1094_v49 }
 0x68f   : > { %2041 = vmatprep.subr.bf16.mxu0 %v2821_v8 }
 0x690   : > { %v1207_v52 = vpop.permute.xlu1 %1206 }
 0x691   : > { %v1212_v55 = vsel %vm861_vm6, %v1207_v52, 0 }
 0x693   : > { %v2302_v50 = vpop.eup %2301 }
 0x694   : > { %v1086_v51 = vmul.f32 %v2302_v50, %v2296_v33  ;;  %v2304_v54 = vpop.eup %2303  ;;  %v2268_v33 = vld [vmem:[#allocation20 + $0x8] sm:$0xff]  }
 0x695   : > { %v1204_v56 = vmul.f32 %v2304_v54, %v2294_v27 }
 0x696   : > { %v1087_v53 = vpack.c.bf16 %v1086_v51, %v1086_v51 }
 0x697   : > { %v1205_v57 = vpack.c.bf16 %v1204_v56, %v1204_v56 }
 0x698   : > { %2032 = vmatmul.mubr.msk.bf16.vlgmr.msra.gmra.mrb[16].mxu0 %vm789_vm4, %v1087_v53 }
 0x699   : > { %2042 = vmatpush3.bf16.msra.mxu0 %v1212_v55  ;;  %2043 = vmatprep.mubr.msk.bf16.mxu0 %vm2822_vm1, %v2821_v8 }
 0x69a   : > { %2055 = vmatprep.subr.bf16.mxu0 %v2821_v8 }
 0x6a0   : > { %2044 = vmatmul.mubr.msk.bf16.vlgmr.msra.gmra.mrb[20].mxu0 %vm789_vm4, %v1205_v57 }
 0x6a1   : > { %2067 = vmatprep.mubr.msk.bf16.mxu0 %vm2822_vm1, %v2821_v8  ;;  %2056 = vmatpush3.bf16.msra.mxu0 %v2267_v32  ;;  %vm3486_vm1 = vmand %vm1374_vm14, %vm1375_vm15 }
 0x6a2   : > { %2057 = vmatprep.subr.bf16.mxu0 %v2821_v8 }
 0x6a5   : > { %2058 = vmatpush3.bf16.msra.mxu0 %v2268_v33 }
 0x6a6   : > { %2059 = vmatprep.subr.bf16.mxu0 %v2821_v8 }
 0x6a9   : > { %2060 = vmatpush3.bf16.msra.mxu0 %v2269_v34 }
 0x6aa   : > { %2061 = vmatprep.subr.bf16.mxu0 %v2821_v8 }
 0x6ad   : > { %2062 = vmatpush3.bf16.msra.mxu0 %v2270_v35  ;;  %v1944_v35 = vld [vmem:[#allocation24] ss:$0 sm:$0xff] }
 0x6ae   : > { %2063 = vmatprep.subr.bf16.mxu0 %v2821_v8 }
 0x6b1   : > { %2064 = vmatpush3.bf16.msra.mxu0 %v2271_v43 }
 0x6b2   : > { %2065 = vmatprep.subr.bf16.mxu0 %v2821_v8 }
 0x6b5   : > { %2066 = vmatpush3.bf16.msra.mxu0 %v2272_v45 }
 0x736   : > { %v899_v58 = vpop.f32.mrb[8].mxu0 }
 0x737   : > { %905 = vst.msk [vmem:[#allocation2] sm:$0xff] %vm789_vm4, %v899_v58  ;;  %v2009_v59 = vpop.f32.mrb[9].mxu0 }
 0x738   : > { %v902_v60 = vpop.f32.mrb[10].mxu0 }
 0x739   : > { %v2010_v61 = vpop.f32.mrb[11].mxu0 }
 0x743   : > { %v1012_v62 = vpop.f32.mrb[12].mxu0 }
 0x744   : > { %1019 = vrot.lane.b32.xlu0 %v1012_v62, %s2834_s0  ;;  %v2021_v63 = vpop.f32.mrb[13].mxu0  ;;  %s2709_s0 = sshll.u32 %s2839_s21, 4  ;;  %s2710_s0 = int_to_ptr.vmem [resolvable:$false] %s2709_s0 }
 0x745   : > { %v1015_v0 = vpop.f32.mrb[14].mxu0  ;;  %p2712_p13 = scmp.lt.s32.totalorder %s3510_s3, %s2710_s0 }
 0x746   : > { %v2022_v1 = vpop.f32.mrb[15].mxu0 }
 0x747   : > { %v2273_v1 = vld [vmem:[#allocation23] sm:$0xff]  }
 0x76b   : > { %v1130_v4 = vpop.f32.mrb[16].mxu0 }
 0x76c   : > { %1137 = vrot.lane.b32.xlu1 %v1130_v4, %s2835_s19  ;;  %v2033_v5 = vpop.f32.mrb[17].mxu0  ;;  %v2275_v4 = vld [vmem:[#allocation23 + $0x10] sm:$0xff]   ;;  %s2711_s19 = scalar_lea.vmem %s2710_s0, 256 }
 0x76d   : > { %v1133_v6 = vpop.f32.mrb[18].mxu0  ;;  %v2276_v5 = vld [vmem:[#allocation23 + $0x18] sm:$0xff]   ;;  %p2713_p1 = scmp.lt.s32.totalorder %s2711_s19, %s2705_s17 }
 0x76e   : > { %v2034_v7 = vpop.f32.mrb[19].mxu0  ;;  %v2277_v6 = vld [vmem:[#allocation23 + $0x20] sm:$0xff]  }
 0x76f   : > { %v2278_v7 = vld [vmem:[#allocation23 + $0x28] sm:$0xff]   ;;  %p2714_p3 = por %p2713_p1, %p2712_p13 }
 0x771   : > { %p2715_p2 = pnand %p2714_p3, %p2708_p4 }
 0x773   : > { %v1248_v9 = vpop.f32.mrb[20].mxu0 }
 0x774   : > { %1255 = vrot.lane.b32.xlu0 %v1248_v9, %s2836_s27  ;;  %v2045_v10 = vpop.f32.mrb[21].mxu0  ;;  %v2279_v9 = vld [vmem:[#allocation23 + $0x30] sm:$0xff]  }
 0x775   : > { %v1251_v11 = vpop.f32.mrb[22].mxu0  ;;  %v2280_v10 = vld [vmem:[#allocation23 + $0x38] sm:$0xff]  }
 0x776   : > { %v2046_v12 = vpop.f32.mrb[23].mxu0  ;;  %v2281_v11 = vld [vmem:[#allocation23 + $0x40] sm:$0xff]  }
 0x777   : > { %v2282_v12 = vld [vmem:[#allocation23 + $0x48] sm:$0xff]  }
 0x7b6   : > { %v1020_v13 = vpop.permute.xlu0 %1019 }
 0x7b7   : > { %1023 = vst.msk [vmem:[#allocation2] sm:$0xff] %vm1022_vm7, %v1020_v13  ;;  %v2283_v13 = vld [vmem:[#allocation23 + $0x50] sm:$0xff]  }
 0x7de   : > { %v1138_v14 = vpop.permute.xlu1 %1137 }
 0x7df   : > { %1141 = vst.msk [vmem:[#allocation2] sm:$0xff] %vm1140_vm8, %v1138_v14  ;;  %v2284_v14 = vld [vmem:[#allocation23 + $0x58] sm:$0xff]  }
 0x7e6   : > { %v1256_v15 = vpop.permute.xlu0 %1255 }
 0x7e7   : > { %1259 = vst.msk [vmem:[#allocation2] sm:$0xff] %vm1258_vm9, %v1256_v15  ;;  %v1936_v15 = vld [vmem:[#allocation21] ss:$0 sm:$0xff] }
 0x7ee   : > { %v1260_v16 = vld [vmem:[#allocation2] sm:$0xff] }
 0x7ef   : > { %v1261_v17 = vpack.c.bf16 %v1260_v16, %v1260_v16 }
 0x7f1   : > { %2052 = vmatmul.mubr.msk.bf16.vlgmr.msra.gmra.mrb[12].mxu1 %vm682_vm0, %v1261_v17 }
 0x7f2   : > { %1624 = vmatpush1.bf16.msra.mxu1 %v2273_v1 }
 0x7f3   : > { %1625 = vmatprep.subr.bf16.mxu1 %v2838_v2 }
 0x7f6   : > { %1626 = vmatpush1.bf16.msra.mxu1 %v2274_v3 }
 0x7f7   : > { %1627 = vmatprep.subr.bf16.mxu1 %v2838_v2 }
 0x7fa   : > { %1628 = vmatpush1.bf16.msra.mxu1 %v2275_v4 }
 0x7fb   : > { %1629 = vmatprep.subr.bf16.mxu1 %v2838_v2 }
 0x7fe   : > { %1630 = vmatpush1.bf16.msra.mxu1 %v2276_v5 }
 0x7ff   : > { %1631 = vmatprep.subr.bf16.mxu1 %v2838_v2 }
 0x802   : > { %1632 = vmatpush1.bf16.msra.mxu1 %v2277_v6 }
 0x803   : > { %1633 = vmatprep.subr.bf16.mxu1 %v2838_v2 }
 0x806   : > { %1634 = vmatpush1.bf16.msra.mxu1 %v2278_v7 }
 0x807   : > { %1635 = vmatprep.subr.bf16.mxu1 %v2838_v2 }
 0x80a   : > { %1636 = vmatpush1.bf16.msra.mxu1 %v2279_v9 }
 0x80b   : > { %1637 = vmatprep.subr.bf16.mxu1 %v2838_v2 }
 0x80e   : > { %1638 = vmatpush1.bf16.msra.mxu1 %v2280_v10 }
 0x80f   : > { %1639 = vmatprep.subr.bf16.mxu1 %v2838_v2 }
 0x812   : > { %1640 = vmatpush1.bf16.msra.mxu1 %v2281_v11 }
 0x813   : > { %1641 = vmatprep.subr.bf16.mxu1 %v2838_v2 }
 0x816   : > { %1642 = vmatpush1.bf16.msra.mxu1 %v2282_v12 }
 0x817   : > { %1643 = vmatprep.subr.bf16.mxu1 %v2838_v2 }
 0x81a   : > { %1644 = vmatpush1.bf16.msra.mxu1 %v2283_v13 }
 0x81b   : > { %1645 = vmatprep.subr.bf16.mxu1 %v2838_v2 }
 0x81e   : > { %1646 = vmatpush1.bf16.msra.mxu1 %v2284_v14 }
 0x8c4   : > { %v1322_v19 = vpop.f32.mrb[12].mxu1 }
 0x8c5   : > { %v1323_v20 = vadd.f32 %v1930_v18, %v1322_v19  ;;  %v2053_v21 = vpop.f32.mrb[13].mxu1 }
 0x8c6   : > { %v1325_v22 = vpop.f32.mrb[14].mxu1 }
 0x8c7   : > { %v3467_v23 = vadd.f32 %v1323_v20, %v1323_v20  ;;  %v2054_v24 = vpop.f32.mrb[15].mxu1 }
 0x8c9   : > { %v1331_v25 = vsel %vm682_vm0, %v3467_v23, 0.0 }
 0x8ca   : > { %1332 = vadd.xlane.f32.xlu1 %v1331_v25 }
 0x957   : > { %v1333_v26 = vpop.xlane.xlu1 %1332 }
 0x958   : > { %v1334_v27 = vmul.f32 0.03125, %v1333_v26 }
 0x95a   : > { %v1335_v28 = vsub.f32 %v3467_v23, %v1334_v27 }
 0x95c   : > { %v1336_v29 = vmul.f32 %v1335_v28, %v1335_v28  ;;  %v1356_v46 = vmul.f32 %v1934_v44, %v1335_v28 }
 0x95e   : > { %v1337_v31 = vsel %vm682_vm0, %v1336_v29, 0.0 }
 0x95f   : > { %1338 = vadd.xlane.f32.xlu0 %v1337_v31 }
 0x9ec   : > { %v1339_v36 = vpop.xlane.xlu0 %1338 }
 0x9ed   : > { %v1340_v37 = vmul.f32 0.032258064, %v1339_v36 }
 0x9ef   : > { %2305 = vrsqrt.f32 %v1340_v37  ;;  %vm1343_vm10 = vcmp.eq.f32.partialorder %v1340_v37, inf  ;;  %v1346_v40 = vand.u32 2147483648, %v1340_v37  ;;  %vm1345_vm11 = vcmp.eq.f32.partialorder %v1340_v37, 0.0 }
 0x9f9   : > { %v2306_v38 = vpop.eup %2305 }
 0x9fa   : > { %v1342_v39 = vmul.f32 %v2306_v38, %v1340_v37 }
 0x9fc   : > { %v1344_v41 = vsel %vm1343_vm10, %v1340_v37, %v1342_v39 }
 0x9fd   : > { %v1347_v30 = vsel %vm1345_vm11, %v1346_v40, %v1344_v41 }
 0x9fe   : > { %v1348_v42 = vadd.f32 1e-06, %v1347_v30 }
 0xa00   : > { %2307 = vrcp.f32 %v1348_v42 }
 0xa0a   : > { %v2308_v47 = vpop.eup %2307 }
 0xa0b   : > { %v1357_v49 = vmul.f32 %v2308_v47, %v1356_v46 }
 0xa0d   : > { %v1364_v50 = vadd.f32 %v1935_v48, %v1357_v49 }
 0xa0f   : > { %v1365_v51 = vpack.c.bf16 %v1364_v50, %v1364_v50 }
 0xa11   : > { %1386 = vrot.lane.b32.xlu0 %v1365_v51, %s2837_s1  ;;  %v1367_v52 = vshrl.u32 %v1365_v51, 16  ;;  %v1370_v53 = vshll.u32 %v1365_v51, 16 }
 0xa13   : > { %v1378_v54 = vrot.slane %v1370_v53, 1  ;;  %v1369_v55 = vrot.slane %v1367_v52, 7 }
 0xa15   : > { %v1379_v8 = vor.u32 %v1378_v54, %v1367_v52  ;;  %v1372_v57 = vor.u32 %v1370_v53, %v1369_v55 }
 0xa17   : > { %v1384_v58 = vsel %vm3479_vm13, %v1379_v8, 0  ;;  %v1377_v61 = vsel %vm3486_vm1, 0, %v1372_v57 }
 0xa18   : > { %1389 = vrot.lane.b32.xlu1 %v1384_v58, %s2830_s23 }
 0xa83   : > { %v1387_v60 = vpop.permute.xlu0 %1386 }
 0xa84   : > { %v1393_v62 = vsel %vm682_vm0, %v1377_v61, %v1387_v60 }
 0xa8a   : > { %v1390_v63 = vpop.permute.xlu1 %1389 }
 0xa8b   : > { %v1396_v0 = vsel %vm1394_vm2, %v1393_v62, %v1390_v63 }
 0xa8c   : > { %2068 = vmatmul.mubr.msk.bf16.vlgmr.msra.gmra.mrb[24].mxu0 %vm1452_vm3, %v1396_v0 }
 0xb5f   : > { %v1489_v16 = vpop.f32.mrb[24].mxu0 }
 0xb60   : > { %v1490_v17 = vadd.f32 %v1936_v15, %v1489_v16  ;;  %v2069_v18 = vpop.f32.mrb[25].mxu0 }
 0xb61   : > { %v1492_v19 = vpop.f32.mrb[26].mxu0 }
 0xb62   : > { %v1495_v20 = vmax.f32 %v1490_v17, 0.0  ;;  %v2070_v21 = vpop.f32.mrb[27].mxu0 }
 0xb64   : > { %v1496_v22 = vpack.c.bf16 %v1495_v20, %v1495_v20 }
 0xb66   : > { %v1498_v24 = vshrl.u32 %v1496_v22, 16  ;;  %v1501_v25 = vshll.u32 %v1496_v22, 16  ;;  %1511 = vrot.lane.b32.xlu1 %v1496_v22, %s2830_s23 }
 0xb68   : > { %v1506_v26 = vrot.slane %v1501_v25, 1  ;;  %v1500_v27 = vrot.slane %v1498_v24, 7 }
 0xb6a   : > { %v1507_v28 = vor.u32 %v1506_v26, %v1498_v24  ;;  %v1503_v29 = vor.u32 %v1501_v25, %v1500_v27 }
 0xb6c   : > { %v1509_v31 = vsel %vm3479_vm13, %v1507_v28, 0  ;;  %v1505_v33 = vsel %vm3486_vm1, 0, %v1503_v29 }
 0xb6d   : > { %1957 = vmatprep.mubr.msk.bf16.mxu1 %vm1394_vm2, %v1509_v31 }
 0xbd8   : > { %v1512_v32 = vpop.permute.xlu1 %1511 }
 0xbd9   : > { %v1515_v34 = vsel %vm1394_vm2, %v1505_v33, %v1512_v32 }
 0xbda   : > { %1656 = vmatmul.mubr.bf16.vlgmr.msra.gmra.mrb[16].mxu1 %v1515_v34 }
 0xcad   : > { %v1657_v36 = vpop.f32.mrb[16].mxu1 }
 0xcae   : > { %v1658_v37 = vadd.f32 %v1944_v35, %v1657_v36  ;;  %v1659_v38 = vpop.f32.mrb[17].mxu1 }
 0xcaf   : > { %v1660_v39 = vpop.f32.mrb[18].mxu1 }
 0xcb0   : > { %v1663_v40 = vadd.f32 %v1658_v37, %v3467_v23  ;;  %v1661_v41 = vpop.f32.mrb[19].mxu1 }
 0xcb2   : > { %1664 = vst.msk [vmem:[%s674_s24] sm:$0xff] %vm682_vm0, %v1663_v40 }
 0xcb3   : > { %2718 = shalt.err (!%p2715_p2)
}
 0xcb4   : > { %s2719_s4 = scalar_lea.hbm %s3508_s25, 128  ;;  %s2723_s14 = scalar_lea.hbm %s3630_s2, 256 }
 0xcb5   : > { %p2720_p10 = scmp.ne.s32.totalorder %s3508_s25, %s2719_s4  ;;  %p2724_p7 = scmp.lt.u32.totalorder %s3508_s25, %s3630_s2 }
 0xcb6   : > { %p2725_p0 = scmp.lt.u32.totalorder %s2723_s14, %s2719_s4  ;;  %p2727_p12 = scmp.lt.u32.totalorder %s2719_s4, %s3508_s25 }
 0xcb7   : > { %p2721_p11 = pnand %p2720_p10, %p3631_p8 }
 0xcb8   : > { %p2726_p6 = por %p2725_p0, %p2724_p7 }
 0xcb9   : > { %p2722_p5 = pneg %p2721_p11 }
 0xcba   : > { %p2728_p9 = por %p2727_p12, %p2726_p6 }
 0xcbc   : > { %p2729_p4 = pnand %p2728_p9, %p2722_p5 }
 0xcbe   : > { %2732 = shalt.err (!%p2729_p4)
}
 0xcbf   : > { %2123 = dma.vmem_to_hbm [thread:$0]  (%p3631_p8), %s3510_s3, 128, %s3508_s25, %s1666_s28  }
 0xcc0 PF: > { %s1691_s23 = sand.u32 1, %s2791_s29   ;;  %p3632_p13 = scmp.ne.s32.totalorder %s3603_s26, 0 }
 0xcc1   : > { %p3633_p1 = scmp.ge.s32.totalorder %s2803_s16, 2  ;;  %s1692_s17 = scalar_lea.sflag [#allocation5], %s1691_s23 }
 0xcc3   : > { %p2170_p3 = pnand %p3633_p1, %p3632_p13 }
 0xcc5   : > { %2786 = dma.done.wait (!%p2170_p3), %s1692_s17, 128  }
 0xcc6   : > { %2788 = vsyncadd (!%p2170_p3), %s1692_s17, 4294967168  ;;  %p36_p2 = scmp.ge.s32.totalorder %s3232_s18, 4   ;;  %s3634_s29 = smov %s2795_s30 }
 0xcc7   : > { %s3635_s30 = smov %s2799_s15  ;;  %s3636_s15 = smov %s3243_s20 }
 0xcc8   : > { %s3637_s16 = smov %s3232_s18  ;;  %38 = sbr.rel (!%p36_p2) target bundleno = 22 (0x16), region = 182 }
 0xccf   :  { %1697 = vsyncpa [#allocation4], 1 }
 0xcd0   :  { %1699 = vsyncpa [#allocation4 + $0x1], 1 }
 0xcd1   :  { %1700 = vsyncpa [#allocation7], 1 }
 0xcd2   :  { %1702 = vsyncpa [#allocation7 + $0x1], 1 }
 0xcd3   :  { %1703 = vsyncpa [#allocation10], 1 }
 0xcd4   :  { %1704 = vsyncpa [#allocation13], 1 }
 0xcd5   :  { %1705 = vsyncpa [#allocation16], 1 }
 0xcd6   :  { %1706 = vsyncpa [#allocation19], 1 }
 0xcd7   :  { %1707 = vsyncpa [#allocation22], 1 }
 0xcd8   :  { %1708 = vsyncpa [#allocation25], 1 }
 0xcd9   :  { %1709 = vsyncpa [#allocation5], 1 }
 0xcda   :  { %1711 = vsyncpa [#allocation5 + $0x1], 1 }

</bundles_post_ra>
